<compile_context>
chip_gen: v7x
topology: tpu7x:2x2x1
jax: 0.10.0
libtpu: 0.0.40
codegen_flags: <defaults>
</compile_context>

<pallas_src>
import jax
import jax.numpy as jnp
from jax import lax
from jax.experimental import pallas as pl
from jax.experimental.pallas import tpu as pltpu


# ----------------------------------------------------------------------------------
# Chip-aware VMEM budget
# ----------------------------------------------------------------------------------
def _tpu_vmem_limit():
    try:
        cap = int(pltpu.get_tpu_info().vmem_capacity_bytes)
    except Exception:
        cap = 64 * 1024 * 1024                      # conservative: v7x physical VMEM
    return int(max(32 * 1024 * 1024, min(cap - 16 * 1024 * 1024, 112 * 1024 * 1024)))


_VMEM_LIMIT = _tpu_vmem_limit()

# frame sign enumeration, identical ordering to the PyTorch reference `ops`
_OPS = jnp.array([[i, j, k] for i in (-1.0, 1.0) for j in (-1.0, 1.0) for k in (-1.0, 1.0)],
                 dtype=jnp.float32)                 # (8, 3)


def _pick_div(n, cap, aligns=(16, 8)):
    """Largest divisor of n that is <= cap and a multiple of one of `aligns` (tried in order).
    Returns n itself when n <= cap.  Falls back to n only for pathological sizes with no
    aligned divisor under the budget (realistic padded lengths always have one)."""
    if n <= cap:
        return n
    for align in aligns:
        start = (min(cap, n) // align) * align
        for d in range(start, 0, -align):
            if n % d == 0:
                return d
    return n


def _pick_time_tile(T, Bf, hid):
    # recurrence per-step VMEM bytes (x2 double buffering):
    #   u_f + u_b (bf16, 4*hid each) + h_f + h_b (bf16, hid each) + two f32 masks
    per_step = 2 * (2 * Bf * 4 * hid * 2 + 2 * Bf * hid * 2 + 2 * Bf * 4)
    cap = max(1, (_VMEM_LIMIT // 2) // per_step)
    return _pick_div(T, cap, aligns=(8,))


def _proj_row_cap(hid, hid4):
    per_row = 2 * (2 * hid * 2 + 2 * hid4 * 2)      # bf16 inputs + bf16 outputs, x2 buffers
    return max(16, min(2048, (_VMEM_LIMIT // 2) // per_row))


# ----------------------------------------------------------------------------------
# XLA glue: masked center, 3x3 covariance, eigh, rotated coordinates.
# (Tiny per-batch reductions; kept out of Pallas per perf review.)
# ----------------------------------------------------------------------------------
def frame_vectors(X_ca, mask):
    m = mask[..., None].astype(jnp.float32)                       # (B, L, 1)
    msum = jnp.maximum(jnp.sum(m, axis=1), 1.0)                   # guard fully-padded sequences
    center = jnp.sum(X_ca * m, axis=1) / msum                     # (B, 3)
    Xc = X_ca - center[:, None, :] * m                            # padded rows keep raw coords
    C = jnp.einsum("bli,blj->bij", Xc, Xc)
    _, V = jnp.linalg.eigh(C)        # TODO(synk): eigh kept in JAX glue (3x3, detached)
    return jnp.einsum("bli,bij->blj", Xc, V)                      # xv = Xc @ V, (B, L, 3)


# ----------------------------------------------------------------------------------
# Kernel 1: fused layer-0 gate construction (frame coords + embedding + feature proj + bias)
#   U[d][t, b*8+o, g*hid+c] = sum_i ops[o,i] * xv[b,t,i] * Wc[d,g,i,c]
#                             + (onehot(token[b,t]) @ table[d])[g*hid+c]
#   gate order per direction: [xtilde, f, r, res]; f/r biases pre-folded into `table`.
# ----------------------------------------------------------------------------------
def _frame_u0_kernel(xv_ref, tok_ref, weff_ref, table_ref, uf_ref, ub_ref):
    nb = xv_ref.shape[0]
    tc = xv_ref.shape[1]
    v2 = table_ref.shape[1]
    iota = lax.broadcasted_iota(jnp.int32, (tc, v2), 1)
    for b in range(nb):                                           # small static unroll over batch
        xv = xv_ref[b]                                            # (tc, 3) f32
        onehot = (iota == tok_ref[b]).astype(jnp.bfloat16)        # (tc, V2)
        for d, out_ref in ((0, uf_ref), (1, ub_ref)):
            seq = jnp.dot(onehot, table_ref[d],
                          preferred_element_type=jnp.float32)     # (tc, 4*hid), bias folded
            coord = (xv[:, 0:1, None] * weff_ref[d, 0][None]
                     + xv[:, 1:2, None] * weff_ref[d, 1][None]
                     + xv[:, 2:3, None] * weff_ref[d, 2][None])   # (tc, 8, 4*hid)
            out_ref[:, b * 8:(b + 1) * 8, :] = (coord + seq[:, None, :]).astype(out_ref.dtype)


def frame_u0(xv, tokens, layer0, tc):
    B, T, _ = xv.shape
    v2, hid4 = layer0["table"].shape[1], layer0["table"].shape[2]
    Bf = B * 8
    nT = T // tc
    u_shape = jax.ShapeDtypeStruct((T, Bf, hid4), jnp.bfloat16)
    return pl.pallas_call(
        _frame_u0_kernel,
        grid=(nT,),
        in_specs=[pl.BlockSpec((B, tc, 3), lambda i: (0, i, 0)),
                  pl.BlockSpec((B, tc, 1), lambda i: (0, i, 0)),
                  pl.BlockSpec((2, 3, 8, hid4), lambda i: (0, 0, 0, 0)),
                  pl.BlockSpec((2, v2, hid4), lambda i: (0, 0, 0))],
        out_specs=[pl.BlockSpec((tc, Bf, hid4), lambda i: (i, 0, 0)),
                   pl.BlockSpec((tc, Bf, hid4), lambda i: (i, 0, 0))],
        out_shape=[u_shape, u_shape],
        compiler_params=pltpu.CompilerParams(
            dimension_semantics=("parallel",),
            vmem_limit_bytes=_VMEM_LIMIT),
    )(xv.astype(jnp.float32), tokens, layer0["weff"], layer0["table"])


# ----------------------------------------------------------------------------------
# Kernel 2: gate projections for layers >= 1 (both directions per grid step, MXU bf16)
#   U[d] = h_f @ Wf[d] + h_b @ Wb[d] + bias_row[d]     (f32 accumulate, bf16 store)
# ----------------------------------------------------------------------------------
def _proj_kernel(hf_ref, hb_ref, wf_ref, wb_ref, brow_ref, uf_ref, ub_ref):
    hf = hf_ref[...]
    hb = hb_ref[...]
    for d, out_ref in ((0, uf_ref), (1, ub_ref)):
        acc = jnp.dot(hf, wf_ref[d], preferred_element_type=jnp.float32)
        acc = acc + jnp.dot(hb, wb_ref[d], preferred_element_type=jnp.float32)
        out_ref[...] = (acc + brow_ref[d]).astype(out_ref.dtype)


def proj_gates(hf, hb, layer):
    T, Bf, hid = hf.shape
    hid4 = layer["wf"].shape[2]
    R = T * Bf
    rt = _pick_div(R, _proj_row_cap(hid, hid4), aligns=(16, 8))   # Bf = B*8 => 8 | R always
    u_shape = jax.ShapeDtypeStruct((R, hid4), jnp.bfloat16)
    uf, ub = pl.pallas_call(
        _proj_kernel,
        grid=(R // rt,),
        in_specs=[pl.BlockSpec((rt, hid), lambda r: (r, 0)),
                  pl.BlockSpec((rt, hid), lambda r: (r, 0)),
                  pl.BlockSpec((2, hid, hid4), lambda r: (0, 0, 0)),
                  pl.BlockSpec((2, hid, hid4), lambda r: (0, 0, 0)),
                  pl.BlockSpec((2, 1, hid4), lambda r: (0, 0, 0))],
        out_specs=[pl.BlockSpec((rt, hid4), lambda r: (r, 0)),
                   pl.BlockSpec((rt, hid4), lambda r: (r, 0))],
        out_shape=[u_shape, u_shape],
        compiler_params=pltpu.CompilerParams(
            dimension_semantics=("parallel",),
            vmem_limit_bytes=_VMEM_LIMIT),
    )(hf.reshape(R, hid), hb.reshape(R, hid), layer["wf"], layer["wb"], layer["brow"])
    return uf.reshape(T, Bf, hid4), ub.reshape(T, Bf, hid4)


# ----------------------------------------------------------------------------------
# Kernel 3: bidirectional SRU recurrence, both directions interleaved per time chunk.
#   grid = (time_chunk,); fwd consumes chunks ascending, bwd consumes chunks descending;
#   two independent carry chains per step fill the VLIW/EUP slots on 1-TC chips.
#   gate lane order per direction: [xtilde, f, r, res]; f/r biases already folded into U.
# ----------------------------------------------------------------------------------
def _sru_kernel(uf_ref, ub_ref, mf_ref, mb_ref, v_ref, hf_ref, hb_ref, cf_ref, cb_ref):
    @pl.when(pl.program_id(0) == 0)
    def _init():
        cf_ref[...] = jnp.zeros_like(cf_ref)
        cb_ref[...] = jnp.zeros_like(cb_ref)

    tc = uf_ref.shape[0]
    hid = cf_ref.shape[1]
    vf_f, vr_f = v_ref[0, 0:1, :], v_ref[0, 1:2, :]               # (1, hid) f32
    vf_b, vr_b = v_ref[1, 0:1, :], v_ref[1, 1:2, :]

    def dir_step(u_ref, m_ref, out_ref, t, c, vf, vr):
        xt = u_ref[t, :, 0 * hid:1 * hid].astype(jnp.float32)
        fg = u_ref[t, :, 1 * hid:2 * hid].astype(jnp.float32)
        rg = u_ref[t, :, 2 * hid:3 * hid].astype(jnp.float32)
        rs = u_ref[t, :, 3 * hid:4 * hid].astype(jnp.float32)
        mt = m_ref[t]                                             # (Bf, 1); 1 = valid token
        f = jax.nn.sigmoid(fg + vf * c)                           # bias pre-folded into fg/rg
        r = jax.nn.sigmoid(rg + vr * c)
        c_upd = xt + f * (c - xt)
        c_new = jnp.where(mt > 0.5, c_upd, c)                     # padded step keeps state
        h = rs + r * (c_new - rs)
        out_ref[t] = (h * mt).astype(out_ref.dtype)               # zero output on padding
        return c_new

    def step(j, carry):
        cf, cb = carry
        cf = dir_step(uf_ref, mf_ref, hf_ref, j, cf, vf_f, vr_f)            # time ascending
        cb = dir_step(ub_ref, mb_ref, hb_ref, tc - 1 - j, cb, vf_b, vr_b)   # time descending
        return (cf, cb)

    unroll = 4 if tc % 4 == 0 else (2 if tc % 2 == 0 else 1)
    cf, cb = lax.fori_loop(0, tc, step, (cf_ref[...], cb_ref[...]), unroll=unroll)
    cf_ref[...] = cf
    cb_ref[...] = cb


def sru_recurrence(uf, ub, mask_t, v2, tc):
    T, Bf, hid4 = uf.shape
    hid = hid4 // 4
    nT = T // tc
    fwd = lambda i: (i, 0, 0)
    bwd = lambda i: (nT - 1 - i, 0, 0)
    h_shape = jax.ShapeDtypeStruct((T, Bf, hid), jnp.bfloat16)
    return pl.pallas_call(
        _sru_kernel,
        grid=(nT,),
        in_specs=[pl.BlockSpec((tc, Bf, hid4), fwd),
                  pl.BlockSpec((tc, Bf, hid4), bwd),
                  pl.BlockSpec((tc, Bf, 1), fwd),
                  pl.BlockSpec((tc, Bf, 1), bwd),
                  pl.BlockSpec((2, 2, hid), lambda i: (0, 0, 0))],
        out_specs=[pl.BlockSpec((tc, Bf, hid), fwd),
                   pl.BlockSpec((tc, Bf, hid), bwd)],
        out_shape=[h_shape, h_shape],
        scratch_shapes=[pltpu.VMEM((Bf, hid), jnp.float32),
                        pltpu.VMEM((Bf, hid), jnp.float32)],
        compiler_params=pltpu.CompilerParams(
            dimension_semantics=("arbitrary",),
            vmem_limit_bytes=_VMEM_LIMIT),
    )(uf, ub, mask_t, mask_t, v2)


# ----------------------------------------------------------------------------------
# Kernel 4: mean over the 8 frames, emitted directly in (B, L, H) layout (f32 output).
# ----------------------------------------------------------------------------------
def _frame_mean_kernel(hf_ref, hb_ref, out_ref):
    nb = out_ref.shape[0]
    hid = hf_ref.shape[2]
    for b in range(nb):
        sf = hf_ref[:, b * 8:(b + 1) * 8, :].astype(jnp.float32)
        sb = hb_ref[:, b * 8:(b + 1) * 8, :].astype(jnp.float32)
        out_ref[b, :, 0:hid] = jnp.mean(sf, axis=1)               # forward half
        out_ref[b, :, hid:2 * hid] = jnp.mean(sb, axis=1)         # backward half


def frame_mean(hf, hb, B, tc):
    T, Bf, hid = hf.shape
    nT = T // tc
    return pl.pallas_call(
        _frame_mean_kernel,
        grid=(nT,),
        in_specs=[pl.BlockSpec((tc, Bf, hid), lambda i: (i, 0, 0)),
                  pl.BlockSpec((tc, Bf, hid), lambda i: (i, 0, 0))],
        out_specs=pl.BlockSpec((B, tc, 2 * hid), lambda i: (0, i, 0)),
        out_shape=jax.ShapeDtypeStruct((B, T, 2 * hid), jnp.float32),
        compiler_params=pltpu.CompilerParams(
            dimension_semantics=("parallel",),
            vmem_limit_bytes=_VMEM_LIMIT),
    )(hf, hb)


# ----------------------------------------------------------------------------------
# Parameter re-layout (one-time, parameter-only work; would be cached at model load)
# ----------------------------------------------------------------------------------
def _fold_dir(W, Wres, d, hid):
    # per-direction gate folding, gate order [xtilde, f, r, res]
    if d == 0:
        cols = (W[:, 0:hid], W[:, hid:2 * hid], W[:, 2 * hid:3 * hid], Wres[:, 0:hid])
    else:
        cols = (W[:, 3 * hid:4 * hid], W[:, 4 * hid:5 * hid], W[:, 5 * hid:6 * hid],
                Wres[:, hid:2 * hid])
    return jnp.concatenate(cols, axis=1)                          # (din, 4*hid)


def prepare_params(params):
    emb = jnp.concatenate([params["bind_embedding"], params["tgt_embedding"]], axis=0)  # (2V, H)
    layers = []
    for li, layer in enumerate(params["encoder"]):
        W, Wres = layer["W"], layer["Wres"]
        hid = W.shape[1] // 6
        v = layer["v"].reshape(4, hid).astype(jnp.float32)
        b = layer["b"].reshape(4, hid).astype(jnp.float32)
        v2 = jnp.stack([v[0:2], v[2:4]], axis=0)                  # (2, 2, hid): [vf, vr] per dir
        zeros = jnp.zeros((hid,), jnp.float32)
        brow = jnp.stack([jnp.concatenate([zeros, b[0], b[1], zeros]),
                          jnp.concatenate([zeros, b[2], b[3], zeros])], axis=0)[:, None, :]
        wd = jnp.stack([_fold_dir(W, Wres, 0, hid), _fold_dir(W, Wres, 1, hid)], axis=0)
        if li == 0:
            wc = wd[:, 0:3, :]                                    # coordinate rows, (2, 3, 4h)
            weff = jnp.einsum("oi,dic->dioc", _OPS, wc).astype(jnp.float32)   # (2, 3, 8, 4h)
            wfeat = wd[:, 3:, :]                                  # (2, H, 4h)
            # fused embedding + feature projection + f/r bias (one-hot rows sum to 1)
            table = (jnp.einsum("vh,dhc->dvc", emb, wfeat) + brow).astype(jnp.bfloat16)
            layers.append(dict(kind="first", weff=weff, table=table, v=v2))
        else:
            layers.append(dict(kind="rest",
                               wf=wd[:, 0:hid, :].astype(jnp.bfloat16),       # from fwd half
                               wb=wd[:, hid:2 * hid, :].astype(jnp.bfloat16), # from bwd half
                               brow=brow, v=v2))
    return layers


# ----------------------------------------------------------------------------------
# FAEncoder forward (glue: masks, frame stats/eigh, parameter re-layout, layer loop)
# ----------------------------------------------------------------------------------
def fa_encoder_forward(params, binder, target):
    bind_X, bind_S, bind_A, _ = binder
    tgt_X, tgt_S, tgt_A, _ = target
    B, N = bind_S.shape
    M = tgt_S.shape[1]
    T = N + M
    vocab = params["bind_embedding"].shape[0]
    H = params["bind_embedding"].shape[1]
    hid = H // 2
    Bf = B * 8

    layers = prepare_params(params)                   # in practice cached once at model load

    bind_mask = jnp.minimum(bind_A[:, :, 1], 1).astype(jnp.float32)
    tgt_mask = jnp.minimum(tgt_A[:, :, 1], 1).astype(jnp.float32)
    mask = jnp.concatenate([bind_mask, tgt_mask], axis=1)                     # (B, T)

    X_ca = jnp.concatenate([bind_X, tgt_X], axis=1)[:, :, 1].astype(jnp.float32)   # (B, T, 3)
    xv = frame_vectors(X_ca, mask)                                            # (B, T, 3)

    tokens = jnp.concatenate([bind_S, tgt_S + vocab], axis=1).astype(jnp.int32)[..., None]

    # time-major padding mask shared by every layer (Bf ordering = b*8 + frame)
    mask_t = jnp.broadcast_to(mask[:, None, :], (B, 8, T)).reshape(Bf, T)
    mask_t = mask_t.T.reshape(T, Bf, 1)

    tc = _pick_time_tile(T, Bf, hid)

    uf, ub = frame_u0(xv, tokens, layers[0], tc)                  # (T, Bf, 4*hid) bf16 each
    hf, hb = sru_recurrence(uf, ub, mask_t, layers[0]["v"], tc)   # (T, Bf, hid) bf16 each

    for layer in layers[1:]:
        uf, ub = proj_gates(hf, hb, layer)
        hf, hb = sru_recurrence(uf, ub, mask_t, layer["v"], tc)

    return frame_mean(hf, hb, B, tc)                              # (B, T, H) f32


# ----------------------------------------------------------------------------------
# Deterministic parameter init (shapes follow FAEncoder.__init__)
# ----------------------------------------------------------------------------------
def init_params(key, vocab, H, depth, bert_size, esm_size):
    ks = jax.random.split(key, 4 + depth)
    hid = H // 2
    params = {
        "bind_embedding": 0.1 * jax.random.normal(ks[0], (vocab, H), jnp.float32),
        "tgt_embedding": 0.1 * jax.random.normal(ks[1], (vocab, H), jnp.float32),
        # present in the module, unused on the token path (bind_S.ndim == 2)
        "W_bind_w": 0.1 * jax.random.normal(ks[2], (bert_size, H), jnp.float32),
        "W_bind_b": jnp.zeros((H,), jnp.float32),
        "W_tgt_w": 0.1 * jax.random.normal(ks[3], (esm_size, H), jnp.float32),
        "W_tgt_b": jnp.zeros((H,), jnp.float32),
        "encoder": [],
    }
    din = H + 3
    for l in range(depth):
        k0, k1, k2 = jax.random.split(ks[4 + l], 3)
        params["encoder"].append({
            "W": 0.1 * jax.random.normal(k0, (din, 6 * hid), jnp.float32),
            "Wres": 0.1 * jax.random.normal(k1, (din, 2 * hid), jnp.float32),
            "v": 0.1 * jax.random.normal(k2, (4 * hid,), jnp.float32),
            "b": jnp.zeros((4 * hid,), jnp.float32),
        })
        din = 2 * hid
    return params


if __name__ == "__main__":
    key = jax.random.PRNGKey(0)
    B, N, M, A = 2, 8, 8, 4
    vocab, H, depth = 21, 32, 2

    keys = jax.random.split(key, 6)
    bind_X = jax.random.normal(keys[0], (B, N, A, 3), jnp.float32)
    tgt_X = jax.random.normal(keys[1], (B, M, A, 3), jnp.float32)
    bind_S = jax.random.randint(keys[2], (B, N), 0, vocab)
    tgt_S = jax.random.randint(keys[3], (B, M), 0, vocab)
    # atom-type tensors; a couple of residues marked as padding (CA atom id == 0)
    bind_A = jnp.full((B, N, A), 14, jnp.int32).at[0, -1, :].set(0)
    tgt_A = jnp.full((B, M, A), 14, jnp.int32).at[1, -2:, :].set(0)

    params = init_params(keys[4], vocab, H, depth, bert_size=64, esm_size=64)

    out = fa_encoder_forward(
        params,
        (bind_X, bind_S, bind_A, None),
        (tgt_X, tgt_S, tgt_A, None),
    )
    out = jax.block_until_ready(out)
    assert out.shape == (B, N + M, H), out.shape
    assert bool(jnp.all(jnp.isfinite(out)))
    print("KERNEL_OK")
</pallas_src>

<mosaic_0001>
module attributes {stable_mosaic.version = 11 : i64} {
  func.func @_frame_u0_kernel(%arg0: i32, %arg1: memref<2x16x3xf32, #tpu.memory_space<vmem>>, %arg2: memref<2x16x1xi32, #tpu.memory_space<vmem>>, %arg3: memref<2x3x8x64xf32, #tpu.memory_space<vmem>>, %arg4: memref<2x42x64xbf16, #tpu.memory_space<vmem>>, %arg5: memref<16x16x64xbf16, #tpu.memory_space<vmem>>, %arg6: memref<16x16x64xbf16, #tpu.memory_space<vmem>>) attributes {dimension_semantics = [#tpu.dimension_semantics<parallel>], iteration_bounds = array<i64: 1>, scalar_prefetch = 0 : i64, scratch_operands = 0 : i64, tpu.core_type = #tpu.core_type<tc>, window_params = [{transform_indices = @transform_0, window_bounds = array<i64: 2, 16, 3>}, {transform_indices = @transform_1, window_bounds = array<i64: 2, 16, 1>}, {pipeline_mode = #tpu.pipeline_mode<synchronous>, transform_indices = @transform_2, window_bounds = array<i64: 2, 3, 8, 64>}, {pipeline_mode = #tpu.pipeline_mode<synchronous>, transform_indices = @transform_3, window_bounds = array<i64: 2, 42, 64>}, {transform_indices = @transform_4, window_bounds = array<i64: 16, 16, 64>}, {transform_indices = @transform_5, window_bounds = array<i64: 16, 16, 64>}]} {
    %0 = tpu.iota {dimensions = array<i32: 1>} : vector<16x42xi32>
    %c0 = arith.constant 0 : index
    %c0_0 = arith.constant 0 : index
    %c0_1 = arith.constant 0 : index
    %1 = vector.load %arg1[%c0, %c0_0, %c0_1] : memref<2x16x3xf32, #tpu.memory_space<vmem>>, vector<1x16x3xf32>
    %2 = vector.shape_cast %1 : vector<1x16x3xf32> to vector<16x3xf32>
    %c0_2 = arith.constant 0 : index
    %c0_3 = arith.constant 0 : index
    %c0_4 = arith.constant 0 : index
    %3 = vector.load %arg2[%c0_2, %c0_3, %c0_4] : memref<2x16x1xi32, #tpu.memory_space<vmem>>, vector<1x16x1xi32>
    %4 = vector.shape_cast %3 : vector<1x16x1xi32> to vector<16x1xi32>
    %5 = vector.broadcast %4 : vector<16x1xi32> to vector<16x42xi32>
    %6 = arith.cmpi eq, %0, %5 : vector<16x42xi32>
    %7 = arith.extui %6 : vector<16x42xi1> to vector<16x42xi32>
    %8 = arith.sitofp %7 : vector<16x42xi32> to vector<16x42xf32>
    %9 = arith.truncf %8 : vector<16x42xf32> to vector<16x42xbf16>
    %c0_5 = arith.constant 0 : index
    %c0_6 = arith.constant 0 : index
    %c0_7 = arith.constant 0 : index
    %10 = vector.load %arg4[%c0_5, %c0_6, %c0_7] : memref<2x42x64xbf16, #tpu.memory_space<vmem>>, vector<1x42x64xbf16>
    %11 = vector.shape_cast %10 : vector<1x42x64xbf16> to vector<42x64xbf16>
    %cst = arith.constant dense<0.000000e+00> : vector<16x64xf32>
    %12 = tpu.matmul %9, %11, %cst {dimension_numbers = #tpu.dot_dimension_numbers<[1], [0], [0], [1], [0, 0, 1, 1], [], []>} : vector<16x42xbf16>, vector<42x64xbf16>, vector<16x64xf32> -> vector<16x64xf32>
    %13 = vector.extract_strided_slice %2 {offsets = [0, 0], sizes = [16, 1], strides = [1, 1]} : vector<16x3xf32> to vector<16x1xf32>
    %14 = vector.shape_cast %13 : vector<16x1xf32> to vector<16x1x1xf32>
    %c0_8 = arith.constant 0 : index
    %c0_9 = arith.constant 0 : index
    %c0_10 = arith.constant 0 : index
    %c0_11 = arith.constant 0 : index
    %15 = vector.load %arg3[%c0_8, %c0_9, %c0_10, %c0_11] : memref<2x3x8x64xf32, #tpu.memory_space<vmem>>, vector<1x1x8x64xf32>
    %16 = vector.shape_cast %15 : vector<1x1x8x64xf32> to vector<8x64xf32>
    %17 = vector.shape_cast %16 : vector<8x64xf32> to vector<1x8x64xf32>
    %18 = vector.broadcast %14 : vector<16x1x1xf32> to vector<16x8x64xf32>
    %19 = vector.broadcast %17 : vector<1x8x64xf32> to vector<16x8x64xf32>
    %20 = arith.mulf %18, %19 : vector<16x8x64xf32>
    %21 = vector.extract_strided_slice %2 {offsets = [0, 1], sizes = [16, 1], strides = [1, 1]} : vector<16x3xf32> to vector<16x1xf32>
    %22 = vector.shape_cast %21 : vector<16x1xf32> to vector<16x1x1xf32>
    %c0_12 = arith.constant 0 : index
    %c1 = arith.constant 1 : index
    %c0_13 = arith.constant 0 : index
    %c0_14 = arith.constant 0 : index
    %23 = vector.load %arg3[%c0_12, %c1, %c0_13, %c0_14] : memref<2x3x8x64xf32, #tpu.memory_space<vmem>>, vector<1x1x8x64xf32>
    %24 = vector.shape_cast %23 : vector<1x1x8x64xf32> to vector<8x64xf32>
    %25 = vector.shape_cast %24 : vector<8x64xf32> to vector<1x8x64xf32>
    %26 = vector.broadcast %22 : vector<16x1x1xf32> to vector<16x8x64xf32>
    %27 = vector.broadcast %25 : vector<1x8x64xf32> to vector<16x8x64xf32>
    %28 = arith.mulf %26, %27 : vector<16x8x64xf32>
    %29 = arith.addf %20, %28 : vector<16x8x64xf32>
    %30 = vector.extract_strided_slice %2 {offsets = [0, 2], sizes = [16, 1], strides = [1, 1]} : vector<16x3xf32> to vector<16x1xf32>
    %31 = vector.shape_cast %30 : vector<16x1xf32> to vector<16x1x1xf32>
    %c0_15 = arith.constant 0 : index
    %c2 = arith.constant 2 : index
    %c0_16 = arith.constant 0 : index
    %c0_17 = arith.constant 0 : index
    %32 = vector.load %arg3[%c0_15, %c2, %c0_16, %c0_17] : memref<2x3x8x64xf32, #tpu.memory_space<vmem>>, vector<1x1x8x64xf32>
    %33 = vector.shape_cast %32 : vector<1x1x8x64xf32> to vector<8x64xf32>
    %34 = vector.shape_cast %33 : vector<8x64xf32> to vector<1x8x64xf32>
    %35 = vector.broadcast %31 : vector<16x1x1xf32> to vector<16x8x64xf32>
    %36 = vector.broadcast %34 : vector<1x8x64xf32> to vector<16x8x64xf32>
    %37 = arith.mulf %35, %36 : vector<16x8x64xf32>
    %38 = arith.addf %29, %37 : vector<16x8x64xf32>
    %39 = vector.shape_cast %12 : vector<16x64xf32> to vector<16x1x64xf32>
    %40 = vector.broadcast %39 : vector<16x1x64xf32> to vector<16x8x64xf32>
    %41 = arith.addf %38, %40 : vector<16x8x64xf32>
    %42 = arith.truncf %41 : vector<16x8x64xf32> to vector<16x8x64xbf16>
    %c0_18 = arith.constant 0 : index
    %c0_19 = arith.constant 0 : index
    %c0_20 = arith.constant 0 : index
    %43 = vector.load %arg5[%c0_18, %c0_19, %c0_20] : memref<16x16x64xbf16, #tpu.memory_space<vmem>>, vector<16x8x64xbf16>
    tpu.vector_store %arg5[%c0_18, %c0_19, %c0_20], %42 {strides = array<i32>} : memref<16x16x64xbf16, #tpu.memory_space<vmem>>, vector<16x8x64xbf16>,
    %c1_21 = arith.constant 1 : index
    %c0_22 = arith.constant 0 : index
    %c0_23 = arith.constant 0 : index
    %44 = vector.load %arg4[%c1_21, %c0_22, %c0_23] : memref<2x42x64xbf16, #tpu.memory_space<vmem>>, vector<1x42x64xbf16>
    %45 = vector.shape_cast %44 : vector<1x42x64xbf16> to vector<42x64xbf16>
    %cst_24 = arith.constant dense<0.000000e+00> : vector<16x64xf32>
    %46 = tpu.matmul %9, %45, %cst_24 {dimension_numbers = #tpu.dot_dimension_numbers<[1], [0], [0], [1], [0, 0, 1, 1], [], []>} : vector<16x42xbf16>, vector<42x64xbf16>, vector<16x64xf32> -> vector<16x64xf32>
    %47 = vector.extract_strided_slice %2 {offsets = [0, 0], sizes = [16, 1], strides = [1, 1]} : vector<16x3xf32> to vector<16x1xf32>
    %48 = vector.shape_cast %47 : vector<16x1xf32> to vector<16x1x1xf32>
    %c1_25 = arith.constant 1 : index
    %c0_26 = arith.constant 0 : index
    %c0_27 = arith.constant 0 : index
    %c0_28 = arith.constant 0 : index
    %49 = vector.load %arg3[%c1_25, %c0_26, %c0_27, %c0_28] : memref<2x3x8x64xf32, #tpu.memory_space<vmem>>, vector<1x1x8x64xf32>
    %50 = vector.shape_cast %49 : vector<1x1x8x64xf32> to vector<8x64xf32>
    %51 = vector.shape_cast %50 : vector<8x64xf32> to vector<1x8x64xf32>
    %52 = vector.broadcast %48 : vector<16x1x1xf32> to vector<16x8x64xf32>
    %53 = vector.broadcast %51 : vector<1x8x64xf32> to vector<16x8x64xf32>
    %54 = arith.mulf %52, %53 : vector<16x8x64xf32>
    %55 = vector.extract_strided_slice %2 {offsets = [0, 1], sizes = [16, 1], strides = [1, 1]} : vector<16x3xf32> to vector<16x1xf32>
    %56 = vector.shape_cast %55 : vector<16x1xf32> to vector<16x1x1xf32>
    %c1_29 = arith.constant 1 : index
    %c1_30 = arith.constant 1 : index
    %c0_31 = arith.constant 0 : index
    %c0_32 = arith.constant 0 : index
    %57 = vector.load %arg3[%c1_29, %c1_30, %c0_31, %c0_32] : memref<2x3x8x64xf32, #tpu.memory_space<vmem>>, vector<1x1x8x64xf32>
    %58 = vector.shape_cast %57 : vector<1x1x8x64xf32> to vector<8x64xf32>
    %59 = vector.shape_cast %58 : vector<8x64xf32> to vector<1x8x64xf32>
    %60 = vector.broadcast %56 : vector<16x1x1xf32> to vector<16x8x64xf32>
    %61 = vector.broadcast %59 : vector<1x8x64xf32> to vector<16x8x64xf32>
    %62 = arith.mulf %60, %61 : vector<16x8x64xf32>
    %63 = arith.addf %54, %62 : vector<16x8x64xf32>
    %64 = vector.extract_strided_slice %2 {offsets = [0, 2], sizes = [16, 1], strides = [1, 1]} : vector<16x3xf32> to vector<16x1xf32>
    %65 = vector.shape_cast %64 : vector<16x1xf32> to vector<16x1x1xf32>
    %c1_33 = arith.constant 1 : index
    %c2_34 = arith.constant 2 : index
    %c0_35 = arith.constant 0 : index
    %c0_36 = arith.constant 0 : index
    %66 = vector.load %arg3[%c1_33, %c2_34, %c0_35, %c0_36] : memref<2x3x8x64xf32, #tpu.memory_space<vmem>>, vector<1x1x8x64xf32>
    %67 = vector.shape_cast %66 : vector<1x1x8x64xf32> to vector<8x64xf32>
    %68 = vector.shape_cast %67 : vector<8x64xf32> to vector<1x8x64xf32>
    %69 = vector.broadcast %65 : vector<16x1x1xf32> to vector<16x8x64xf32>
    %70 = vector.broadcast %68 : vector<1x8x64xf32> to vector<16x8x64xf32>
    %71 = arith.mulf %69, %70 : vector<16x8x64xf32>
    %72 = arith.addf %63, %71 : vector<16x8x64xf32>
    %73 = vector.shape_cast %46 : vector<16x64xf32> to vector<16x1x64xf32>
    %74 = vector.broadcast %73 : vector<16x1x64xf32> to vector<16x8x64xf32>
    %75 = arith.addf %72, %74 : vector<16x8x64xf32>
    %76 = arith.truncf %75 : vector<16x8x64xf32> to vector<16x8x64xbf16>
    %c0_37 = arith.constant 0 : index
    %c0_38 = arith.constant 0 : index
    %c0_39 = arith.constant 0 : index
    %77 = vector.load %arg6[%c0_37, %c0_38, %c0_39] : memref<16x16x64xbf16, #tpu.memory_space<vmem>>, vector<16x8x64xbf16>
    tpu.vector_store %arg6[%c0_37, %c0_38, %c0_39], %76 {strides = array<i32>} : memref<16x16x64xbf16, #tpu.memory_space<vmem>>, vector<16x8x64xbf16>,
    %c1_40 = arith.constant 1 : index
    %c0_41 = arith.constant 0 : index
    %c0_42 = arith.constant 0 : index
    %78 = vector.load %arg1[%c1_40, %c0_41, %c0_42] : memref<2x16x3xf32, #tpu.memory_space<vmem>>, vector<1x16x3xf32>
    %79 = vector.shape_cast %78 : vector<1x16x3xf32> to vector<16x3xf32>
    %c1_43 = arith.constant 1 : index
    %c0_44 = arith.constant 0 : index
    %c0_45 = arith.constant 0 : index
    %80 = vector.load %arg2[%c1_43, %c0_44, %c0_45] : memref<2x16x1xi32, #tpu.memory_space<vmem>>, vector<1x16x1xi32>
    %81 = vector.shape_cast %80 : vector<1x16x1xi32> to vector<16x1xi32>
    %82 = vector.broadcast %81 : vector<16x1xi32> to vector<16x42xi32>
    %83 = arith.cmpi eq, %0, %82 : vector<16x42xi32>
    %84 = arith.extui %83 : vector<16x42xi1> to vector<16x42xi32>
    %85 = arith.sitofp %84 : vector<16x42xi32> to vector<16x42xf32>
    %86 = arith.truncf %85 : vector<16x42xf32> to vector<16x42xbf16>
    %c0_46 = arith.constant 0 : index
    %c0_47 = arith.constant 0 : index
    %c0_48 = arith.constant 0 : index
    %87 = vector.load %arg4[%c0_46, %c0_47, %c0_48] : memref<2x42x64xbf16, #tpu.memory_space<vmem>>, vector<1x42x64xbf16>
    %88 = vector.shape_cast %87 : vector<1x42x64xbf16> to vector<42x64xbf16>
    %cst_49 = arith.constant dense<0.000000e+00> : vector<16x64xf32>
    %89 = tpu.matmul %86, %88, %cst_49 {dimension_numbers = #tpu.dot_dimension_numbers<[1], [0], [0], [1], [0, 0, 1, 1], [], []>} : vector<16x42xbf16>, vector<42x64xbf16>, vector<16x64xf32> -> vector<16x64xf32>
    %90 = vector.extract_strided_slice %79 {offsets = [0, 0], sizes = [16, 1], strides = [1, 1]} : vector<16x3xf32> to vector<16x1xf32>
    %91 = vector.shape_cast %90 : vector<16x1xf32> to vector<16x1x1xf32>
    %c0_50 = arith.constant 0 : index
    %c0_51 = arith.constant 0 : index
    %c0_52 = arith.constant 0 : index
    %c0_53 = arith.constant 0 : index
    %92 = vector.load %arg3[%c0_50, %c0_51, %c0_52, %c0_53] : memref<2x3x8x64xf32, #tpu.memory_space<vmem>>, vector<1x1x8x64xf32>
    %93 = vector.shape_cast %92 : vector<1x1x8x64xf32> to vector<8x64xf32>
    %94 = vector.shape_cast %93 : vector<8x64xf32> to vector<1x8x64xf32>
    %95 = vector.broadcast %91 : vector<16x1x1xf32> to vector<16x8x64xf32>
    %96 = vector.broadcast %94 : vector<1x8x64xf32> to vector<16x8x64xf32>
    %97 = arith.mulf %95, %96 : vector<16x8x64xf32>
    %98 = vector.extract_strided_slice %79 {offsets = [0, 1], sizes = [16, 1], strides = [1, 1]} : vector<16x3xf32> to vector<16x1xf32>
    %99 = vector.shape_cast %98 : vector<16x1xf32> to vector<16x1x1xf32>
    %c0_54 = arith.constant 0 : index
    %c1_55 = arith.constant 1 : index
    %c0_56 = arith.constant 0 : index
    %c0_57 = arith.constant 0 : index
    %100 = vector.load %arg3[%c0_54, %c1_55, %c0_56, %c0_57] : memref<2x3x8x64xf32, #tpu.memory_space<vmem>>, vector<1x1x8x64xf32>
    %101 = vector.shape_cast %100 : vector<1x1x8x64xf32> to vector<8x64xf32>
    %102 = vector.shape_cast %101 : vector<8x64xf32> to vector<1x8x64xf32>
    %103 = vector.broadcast %99 : vector<16x1x1xf32> to vector<16x8x64xf32>
    %104 = vector.broadcast %102 : vector<1x8x64xf32> to vector<16x8x64xf32>
    %105 = arith.mulf %103, %104 : vector<16x8x64xf32>
    %106 = arith.addf %97, %105 : vector<16x8x64xf32>
    %107 = vector.extract_strided_slice %79 {offsets = [0, 2], sizes = [16, 1], strides = [1, 1]} : vector<16x3xf32> to vector<16x1xf32>
    %108 = vector.shape_cast %107 : vector<16x1xf32> to vector<16x1x1xf32>
    %c0_58 = arith.constant 0 : index
    %c2_59 = arith.constant 2 : index
    %c0_60 = arith.constant 0 : index
    %c0_61 = arith.constant 0 : index
    %109 = vector.load %arg3[%c0_58, %c2_59, %c0_60, %c0_61] : memref<2x3x8x64xf32, #tpu.memory_space<vmem>>, vector<1x1x8x64xf32>
    %110 = vector.shape_cast %109 : vector<1x1x8x64xf32> to vector<8x64xf32>
    %111 = vector.shape_cast %110 : vector<8x64xf32> to vector<1x8x64xf32>
    %112 = vector.broadcast %108 : vector<16x1x1xf32> to vector<16x8x64xf32>
    %113 = vector.broadcast %111 : vector<1x8x64xf32> to vector<16x8x64xf32>
    %114 = arith.mulf %112, %113 : vector<16x8x64xf32>
    %115 = arith.addf %106, %114 : vector<16x8x64xf32>
    %116 = vector.shape_cast %89 : vector<16x64xf32> to vector<16x1x64xf32>
    %117 = vector.broadcast %116 : vector<16x1x64xf32> to vector<16x8x64xf32>
    %118 = arith.addf %115, %117 : vector<16x8x64xf32>
    %119 = arith.truncf %118 : vector<16x8x64xf32> to vector<16x8x64xbf16>
    %c0_62 = arith.constant 0 : index
    %c8 = arith.constant 8 : index
    %c0_63 = arith.constant 0 : index
    %120 = vector.load %arg5[%c0_62, %c8, %c0_63] : memref<16x16x64xbf16, #tpu.memory_space<vmem>>, vector<16x8x64xbf16>
    tpu.vector_store %arg5[%c0_62, %c8, %c0_63], %119 {strides = array<i32>} : memref<16x16x64xbf16, #tpu.memory_space<vmem>>, vector<16x8x64xbf16>,
    %c1_64 = arith.constant 1 : index
    %c0_65 = arith.constant 0 : index
    %c0_66 = arith.constant 0 : index
    %121 = vector.load %arg4[%c1_64, %c0_65, %c0_66] : memref<2x42x64xbf16, #tpu.memory_space<vmem>>, vector<1x42x64xbf16>
    %122 = vector.shape_cast %121 : vector<1x42x64xbf16> to vector<42x64xbf16>
    %cst_67 = arith.constant dense<0.000000e+00> : vector<16x64xf32>
    %123 = tpu.matmul %86, %122, %cst_67 {dimension_numbers = #tpu.dot_dimension_numbers<[1], [0], [0], [1], [0, 0, 1, 1], [], []>} : vector<16x42xbf16>, vector<42x64xbf16>, vector<16x64xf32> -> vector<16x64xf32>
    %124 = vector.extract_strided_slice %79 {offsets = [0, 0], sizes = [16, 1], strides = [1, 1]} : vector<16x3xf32> to vector<16x1xf32>
    %125 = vector.shape_cast %124 : vector<16x1xf32> to vector<16x1x1xf32>
    %c1_68 = arith.constant 1 : index
    %c0_69 = arith.constant 0 : index
    %c0_70 = arith.constant 0 : index
    %c0_71 = arith.constant 0 : index
    %126 = vector.load %arg3[%c1_68, %c0_69, %c0_70, %c0_71] : memref<2x3x8x64xf32, #tpu.memory_space<vmem>>, vector<1x1x8x64xf32>
    %127 = vector.shape_cast %126 : vector<1x1x8x64xf32> to vector<8x64xf32>
    %128 = vector.shape_cast %127 : vector<8x64xf32> to vector<1x8x64xf32>
    %129 = vector.broadcast %125 : vector<16x1x1xf32> to vector<16x8x64xf32>
    %130 = vector.broadcast %128 : vector<1x8x64xf32> to vector<16x8x64xf32>
    %131 = arith.mulf %129, %130 : vector<16x8x64xf32>
    %132 = vector.extract_strided_slice %79 {offsets = [0, 1], sizes = [16, 1], strides = [1, 1]} : vector<16x3xf32> to vector<16x1xf32>
    %133 = vector.shape_cast %132 : vector<16x1xf32> to vector<16x1x1xf32>
    %c1_72 = arith.constant 1 : index
    %c1_73 = arith.constant 1 : index
    %c0_74 = arith.constant 0 : index
    %c0_75 = arith.constant 0 : index
    %134 = vector.load %arg3[%c1_72, %c1_73, %c0_74, %c0_75] : memref<2x3x8x64xf32, #tpu.memory_space<vmem>>, vector<1x1x8x64xf32>
    %135 = vector.shape_cast %134 : vector<1x1x8x64xf32> to vector<8x64xf32>
    %136 = vector.shape_cast %135 : vector<8x64xf32> to vector<1x8x64xf32>
    %137 = vector.broadcast %133 : vector<16x1x1xf32> to vector<16x8x64xf32>
    %138 = vector.broadcast %136 : vector<1x8x64xf32> to vector<16x8x64xf32>
    %139 = arith.mulf %137, %138 : vector<16x8x64xf32>
    %140 = arith.addf %131, %139 : vector<16x8x64xf32>
    %141 = vector.extract_strided_slice %79 {offsets = [0, 2], sizes = [16, 1], strides = [1, 1]} : vector<16x3xf32> to vector<16x1xf32>
    %142 = vector.shape_cast %141 : vector<16x1xf32> to vector<16x1x1xf32>
    %c1_76 = arith.constant 1 : index
    %c2_77 = arith.constant 2 : index
    %c0_78 = arith.constant 0 : index
    %c0_79 = arith.constant 0 : index
    %143 = vector.load %arg3[%c1_76, %c2_77, %c0_78, %c0_79] : memref<2x3x8x64xf32, #tpu.memory_space<vmem>>, vector<1x1x8x64xf32>
    %144 = vector.shape_cast %143 : vector<1x1x8x64xf32> to vector<8x64xf32>
    %145 = vector.shape_cast %144 : vector<8x64xf32> to vector<1x8x64xf32>
    %146 = vector.broadcast %142 : vector<16x1x1xf32> to vector<16x8x64xf32>
    %147 = vector.broadcast %145 : vector<1x8x64xf32> to vector<16x8x64xf32>
    %148 = arith.mulf %146, %147 : vector<16x8x64xf32>
    %149 = arith.addf %140, %148 : vector<16x8x64xf32>
    %150 = vector.shape_cast %123 : vector<16x64xf32> to vector<16x1x64xf32>
    %151 = vector.broadcast %150 : vector<16x1x64xf32> to vector<16x8x64xf32>
    %152 = arith.addf %149, %151 : vector<16x8x64xf32>
    %153 = arith.truncf %152 : vector<16x8x64xf32> to vector<16x8x64xbf16>
    %c0_80 = arith.constant 0 : index
    %c8_81 = arith.constant 8 : index
    %c0_82 = arith.constant 0 : index
    %154 = vector.load %arg6[%c0_80, %c8_81, %c0_82] : memref<16x16x64xbf16, #tpu.memory_space<vmem>>, vector<16x8x64xbf16>
    tpu.vector_store %arg6[%c0_80, %c8_81, %c0_82], %153 {strides = array<i32>} : memref<16x16x64xbf16, #tpu.memory_space<vmem>>, vector<16x8x64xbf16>,
    return
  }
  func.func @transform_0(%arg0: i32) -> (i32, i32, i32) {
    %c0_i32 = arith.constant 0 : i32
    %c0_i32_0 = arith.constant 0 : i32
    %c0_i32_1 = arith.constant 0 : i32
    return %c0_i32, %arg0, %c0_i32_0 : i32, i32, i32
  }
  func.func @transform_1(%arg0: i32) -> (i32, i32, i32) {
    %c0_i32 = arith.constant 0 : i32
    %c0_i32_0 = arith.constant 0 : i32
    %c0_i32_1 = arith.constant 0 : i32
    return %c0_i32, %arg0, %c0_i32_0 : i32, i32, i32
  }
  func.func @transform_2(%arg0: i32) -> (i32, i32, i32, i32) {
    %c0_i32 = arith.constant 0 : i32
    %c0_i32_0 = arith.constant 0 : i32
    %c0_i32_1 = arith.constant 0 : i32
    %c0_i32_2 = arith.constant 0 : i32
    %c0_i32_3 = arith.constant 0 : i32
    return %c0_i32, %c0_i32_0, %c0_i32_1, %c0_i32_2 : i32, i32, i32, i32
  }
  func.func @transform_3(%arg0: i32) -> (i32, i32, i32) {
    %c0_i32 = arith.constant 0 : i32
    %c0_i32_0 = arith.constant 0 : i32
    %c0_i32_1 = arith.constant 0 : i32
    %c0_i32_2 = arith.constant 0 : i32
    return %c0_i32, %c0_i32_0, %c0_i32_1 : i32, i32, i32
  }
  func.func @transform_4(%arg0: i32) -> (i32, i32, i32) {
    %c0_i32 = arith.constant 0 : i32
    %c0_i32_0 = arith.constant 0 : i32
    %c0_i32_1 = arith.constant 0 : i32
    return %arg0, %c0_i32, %c0_i32_0 : i32, i32, i32
  }
  func.func @transform_5(%arg0: i32) -> (i32, i32, i32) {
    %c0_i32 = arith.constant 0 : i32
    %c0_i32_0 = arith.constant 0 : i32
    %c0_i32_1 = arith.constant 0 : i32
    return %arg0, %c0_i32, %c0_i32_0 : i32, i32, i32
  }
}

</mosaic_0001>

<bundles_post_ra>
// kernel: tpu_custom_call.1
= control target key start
LH: loop header
LB: loop body
LE: loop exit
PB: predicated region body
PF: predicated region fallthrough
CT: control target
= control target key end

     0   :  { %11 = vsyncpa [#allocation3], 0  ;;  %v22_v1 = vlaneseq  ;;  %v2520_v3 = vmov 0   ;;  %v2521_v4 = vmov 1966171168   ;;  %v2522_v10 = vmov 0.0   ;;  %s3988_s0 = inlined_call_operand.vmem [shape: f32[2,16,3], index: 0, kind: input, shape index: {}]   ;;  %s3989_s1 = inlined_call_operand.vmem [shape: s32[2,16,1], index: 1, kind: input, shape index: {}]   ;;  %s3990_s2 = inlined_call_operand.vmem [shape: f32[2,3,8,64], index: 2, kind: input, shape index: {}]   ;;  %s3991_s3 = inlined_call_operand.vmem [shape: bf16[2,42,64], index: 3, kind: input, shape index: {}]   ;;  %s3992_s4 = inlined_call_operand.hbm [shape: bf16[16,16,64], index: 4, kind: output, shape index: {0}]   ;;  %s3993_s5 = inlined_call_operand.hbm [shape: bf16[16,16,64], index: 5, kind: output, shape index: {1}]  }
   0x1   :  { %v26_v0 = vld [vmem:[%s3989_s1] sm:$0xff]  ;;  %2443 = vset.pattern.permute.xlu0 %v2520_v3  ;;  %2444 = vset.pattern.permute.xlu1 %v2520_v3  ;;  %v117_v5 = vunpack.c.l.s4 %v2521_v4  ;;  %v27_v6 = vld [vmem:[%s3989_s1 + $0x8] sm:$0xff]  ;;  %v2459_v12 = vld [vmem:[%s3991_s3 + $0x18] sm:$0xff]   ;;  %vm68_vm0 = vcmask 1044480  }
   0x2   :  { %v24_v2 = vld [vmem:[%s3988_s0] sm:$0xff]  ;;  %29 = vperm.xlu0 %2443, %v26_v0   ;;  %v120_v7 = vshrl.u32 %v22_v1, 7  ;;  %2393 = vmatprep.subr.bf16.mxu0 %v2522_v10  ;;  %v2460_v14 = vld [vmem:[%s3991_s3 + $0x8] sm:$0xff]   ;;  %v2462_v20 = vld [vmem:[%s3991_s3 + $0x10] sm:$0x1f]  }
   0x3   :  { %v115_v8 = vcombine.high %v24_v2, %v24_v2  ;;  %v118_v9 = vunpack.c.0.s8 %v117_v5  ;;  %2403 = vmatprep.subr.bf16.mxu1 %v2522_v10  ;;  %v2458_v11 = vld [vmem:[%s3991_s3] sm:$0xff]   ;;  %v25_v19 = vld [vmem:[%s3988_s0 + $0x8] sm:$0xff]  ;;  %v70_v35 = vsel %vm68_vm0, %v2462_v20, 0 }
   0x4   :  { %2394 = vmatpush3.bf16.msra.mxu0 %v2458_v11  ;;  %2404 = vmatpush3.bf16.msra.mxu1 %v2459_v12  ;;  %v2461_v15 = vld [vmem:[%s3991_s3 + $0x20] sm:$0xff]   ;;  %v2589_v17 = vsub.s32 0, %v120_v7  ;;  %v2463_v29 = vld [vmem:[%s3991_s3 + $0x28] sm:$0x1f]  }
   0x5   :  { %v2580_v13 = vsub.s32 %v118_v9, %v120_v7  ;;  %2395 = vmatprep.subr.bf16.mxu0 %v2522_v10  ;;  %2405 = vmatprep.subr.bf16.mxu1 %v2522_v10 }
   0x6   :  { %32 = vperm.xlu0 %2443, %v27_v6   ;;  %4013 = vst [vmem:[#allocation9_spill] sm:$0xff] %v2589_v17 }
   0x7   :  { %4012 = vst [vmem:[#allocation8_spill] sm:$0xff] %v2580_v13  ;;  %v129_v16 = vrot.slane %v115_v8, %v2580_v13  ;;  %v122_v18 = vrot.slane %v24_v2, %v2580_v13  ;;  %v171_v31 = vrot.slane %v25_v19, %v2580_v13 }
   0x8   :  { %2396 = vmatpush3.bf16.msra.mxu0 %v2460_v14  ;;  %2406 = vmatpush3.bf16.msra.mxu1 %v2461_v15 }
   0x9   :  { %v145_v21 = vrot.slane %v129_v16, %v2580_v13  ;;  %v138_v22 = vrot.slane %v122_v18, %v2580_v13  ;;  %v130_v23 = vcombine.high %v122_v18, %v122_v18  ;;  %v131_v24 = vcombine.high %v129_v16, %v129_v16  ;;  %2397 = vmatprep.subr.bf16.mxu0 %v2522_v10 }
   0xa   :  { %2407 = vmatprep.subr.bf16.mxu1 %v2522_v10 }
   0xb   :  { %v2603_v25 = vrot.slane %v145_v21, %v2589_v17  ;;  %v2606_v26 = vrot.slane %v138_v22, %v2589_v17  ;;  %v160_v27 = vcombine.high %v138_v22, %v138_v22  ;;  %v152_v28 = vrot.slane %v130_v23, %v2580_v13 }
   0xc   :  { %v161_v30 = vcombine.high %v145_v21, %v145_v21  ;;  %v159_v34 = vrot.slane %v131_v24, %v2580_v13 }
   0xd   :  { %295 = vperm.xlu0 %2443, %v2603_v25   ;;  %279 = vperm.xlu1 %2444, %v2606_v26   ;;  %v2618_v32 = vrot.slane %v160_v27, %v2589_v17  ;;  %v2621_v33 = vrot.slane %v152_v28, %v2589_v17 }
   0xe   :  { %12 = vsyncpa [#allocation5], 0  ;;  %2398 = vmatpush3.bf16.msra.mxu0 %v70_v35  ;;  %v187_v36 = vrot.slane %v171_v31, %v2580_v13  ;;  %v164_v37 = vcombine.high %v25_v19, %v25_v19  ;;  %v2630_v38 = vrot.slane %v161_v30, %v2589_v17  ;;  %v2633_v39 = vrot.slane %v159_v34, %v2589_v17  ;;  %v2352_v52 = vld [vmem:[%s3988_s0 + $0x10] sm:$0xff]  ;;  %v2353_v14 = vld [vmem:[%s3988_s0 + $0x18] sm:$0xff] }
   0xf   :  { %2413 = vmatprep.subr.bf16.mxu0 %v2522_v10  ;;  %v162_v40 = vcombine.high %v152_v28, %v152_v28  ;;  %v808_v41 = vsel %vm68_vm0, %v2463_v29, 0  ;;  %v179_v44 = vcombine.high %v171_v31, %v171_v31  ;;  %v163_v47 = vcombine.high %v159_v34, %v159_v34  ;;  %v2354_v7 = vld [vmem:[%s3989_s1 + $0x10] sm:$0xff] }
  0x10   :  { %2408 = vmatpush3.bf16.msra.mxu1 %v808_v41  ;;  %v2638_v42 = vrot.slane %v187_v36, %v2589_v17  ;;  %v178_v43 = vrot.slane %v164_v37, %v2580_v13  ;;  %v209_v46 = vcombine.high %v187_v36, %v187_v36  ;;  %vm2523_vm1 = vmmov 0   ;;  %v2355_v36 = vld [vmem:[%s3989_s1 + $0x18] sm:$0xff] }
  0x11   :  { %287 = vperm.xlu0 %2443, %v2618_v32   ;;  %283 = vperm.xlu1 %2444, %v2621_v33   ;;  %v2644_v45 = vrot.slane %v162_v40, %v2589_v17  ;;  %v2657_v50 = vrot.slane %v163_v47, %v2589_v17  ;;  %v201_v51 = vrot.slane %v179_v44, %v2580_v13  ;;  %v2524_v20 = vmov 1  }
  0x12   :  { %2423 = vmatprep.subr.bf16.mxu1 %v2522_v10  ;;  %2399 = vmatprep.mubr.msk.bf16.mxu0 %vm2523_vm1, %v2522_v10  ;;  %v194_v48 = vrot.slane %v178_v43, %v2580_v13  ;;  %v2654_v49 = vrot.slane %v209_v46, %v2589_v17  ;;  %v180_v54 = vcombine.high %v178_v43, %v178_v43  ;;  %v2525_v43 = vmov 2  }
  0x13   :  { %2409 = vmatprep.mubr.msk.bf16.mxu1 %vm2523_vm1, %v2522_v10  ;;  %v1263_v55 = vrot.slane %v2352_v52, %v2580_v13  ;;  %v2670_v56 = vrot.slane %v201_v51, %v2589_v17  ;;  %v211_v58 = vcombine.high %v201_v51, %v201_v51  ;;  %v1256_v60 = vcombine.high %v2352_v52, %v2352_v52 }
  0x14   :  { %v2664_v53 = vrot.slane %v194_v48, %v2589_v17  ;;  %v210_v57 = vcombine.high %v194_v48, %v194_v48  ;;  %v208_v59 = vrot.slane %v180_v54, %v2580_v13  ;;  %v1312_v18 = vrot.slane %v2353_v14, %v2580_v13 }
  0x15   :  { %303 = vperm.xlu0 %2443, %v2630_v38   ;;  %299 = vperm.xlu1 %2444, %v2633_v39   ;;  %v2679_v62 = vrot.slane %v211_v58, %v2589_v17  ;;  %v1271_v63 = vcombine.high %v1263_v55, %v1263_v55  ;;  %v2682_v0 = vrot.slane %v1263_v55, %v2580_v13  ;;  %v2811_v55 = vand.u32 127, %v22_v1 }
  0x16   :  { %v2676_v61 = vrot.slane %v210_v57, %v2589_v17  ;;  %v2685_v2 = vrot.slane %v1256_v60, %v2580_v13  ;;  %v2690_v4 = vrot.slane %v208_v59, %v2589_v17  ;;  %v212_v5 = vcombine.high %v208_v59, %v208_v59 }
  0x17   :  { %v2693_v6 = vrot.slane %v1271_v63, %v2580_v13  ;;  %v2700_v8 = vrot.slane %v2682_v0, %v2589_v17  ;;  %v1305_v19 = vcombine.high %v2353_v14, %v2353_v14  ;;  %v1320_v23 = vcombine.high %v1312_v18, %v1312_v18  ;;  %v2464_v63 = vld [vmem:[%s3991_s3] sm:$0xff]  }
  0x18   :  { %v2704_v9 = vrot.slane %v212_v5, %v2589_v17  ;;  %v1272_v12 = vcombine.high %v2685_v2, %v2685_v2  ;;  %v1286_v46 = vrot.slane %v2685_v2, %v2580_v13  ;;  %v1328_v47 = vrot.slane %v1312_v18, %v2580_v13  ;;  %v2467_v5 = vld [vmem:[%s3991_s3 + $0x20] sm:$0xff]  }
  0x19   :  { %311 = vperm.xlu0 %2443, %v2638_v42   ;;  %291 = vperm.xlu1 %2444, %v2644_v45   ;;  %v1303_v11 = vcombine.high %v2693_v6, %v2693_v6  ;;  %v1342_v27 = vrot.slane %v1320_v23, %v2580_v13  ;;  %v1319_v28 = vrot.slane %v1305_v19, %v2580_v13  ;;  %vm64_vm4 = vcmask 343040  }
  0x1a   :  { %v1300_v16 = vrot.slane %v1272_v12, %v2580_v13  ;;  %v2777_v44 = vrot.slane %v2693_v6, %v2589_v17  ;;  %v1350_v48 = vcombine.high %v1328_v47, %v1328_v47  ;;  %v1301_v57 = vcombine.high %v2682_v0, %v2682_v0  ;;  %v2465_v0 = vld [vmem:[%s3991_s3 + $0x18] sm:$0xff]   ;;  %v2469_v6 = vld [vmem:[%s3991_s3 + $0x28] sm:$0x1f]  }
  0x1b   :  { %v2716_v15 = vrot.slane %v1303_v11, %v2589_v17  ;;  %v2735_v29 = vrot.slane %v1342_v27, %v2589_v17  ;;  %v1352_v30 = vcombine.high %v1342_v27, %v1342_v27  ;;  %v1321_v31 = vcombine.high %v1319_v28, %v1319_v28 }
  0x1c   :  { %v2723_v21 = vrot.slane %v1300_v16, %v2589_v17  ;;  %v1304_v22 = vcombine.high %v1300_v16, %v1300_v16  ;;  %v1335_v51 = vrot.slane %v1319_v28, %v2580_v13  ;;  %v2823_v59 = vrot.slane %v1301_v57, %v2589_v17 }
  0x1d   :  { %319 = vperm.xlu0 %2443, %v2654_v49   ;;  %307 = vperm.xlu1 %2444, %v2657_v50   ;;  %v2740_v34 = vrot.slane %v1352_v30, %v2589_v17  ;;  %v1349_v35 = vrot.slane %v1321_v31, %v2580_v13  ;;  %v1945_v12 = vsel %vm68_vm0, %v2469_v6, 0  ;;  %vm766_vm7 = vcmask 519168  }
  0x1e   :  { %v2728_v24 = vrot.slane %v1304_v22, %v2589_v17  ;;  %v2806_v52 = vrot.slane %v1335_v51, %v2589_v17  ;;  %v1351_v54 = vcombine.high %v1335_v51, %v1335_v51 }
  0x1f   :  { %v2749_v37 = vrot.slane %v1349_v35, %v2589_v17  ;;  %v1353_v40 = vcombine.high %v1349_v35, %v1349_v35  ;;  %v2933_v35 = vld [vmem:[%s3990_s2 + $0x8] sm:$0xff] }
  0x21   :  { %327 = vperm.xlu0 %2443, %v2664_v53   ;;  %315 = vperm.xlu1 %2444, %v2670_v56   ;;  %v2754_v41 = vrot.slane %v1353_v40, %v2589_v17 }
  0x25   :  { %335 = vperm.xlu0 %2443, %v2676_v61   ;;  %323 = vperm.xlu1 %2444, %v2679_v62  }
  0x29   :  { %1172 = vperm.xlu0 %2443, %v2354_v7   ;;  %331 = vperm.xlu1 %2444, %v2690_v4  }
  0x2d   :  { %1420 = vperm.xlu0 %2443, %v2700_v8   ;;  %339 = vperm.xlu1 %2444, %v2704_v9  }
  0x31   :  { %1432 = vperm.xlu0 %2443, %v2716_v15   ;;  %2445 = vset.pattern.permute.xlu1 %v2524_v20 }
  0x32   :  { %365 = vperm.xlu1 %2445, %v2621_v33  }
  0x35   :  { %1440 = vperm.xlu0 %2443, %v2723_v21  }
  0x36   :  { %369 = vperm.xlu1 %2445, %v2618_v32  }
  0x39   :  { %1448 = vperm.xlu0 %2443, %v2728_v24  }
  0x3a   :  { %377 = vperm.xlu1 %2445, %v2603_v25  }
  0x3d   :  { %1456 = vperm.xlu0 %2443, %v2735_v29  }
  0x3e   :  { %385 = vperm.xlu1 %2445, %v2630_v38  }
  0x41   :  { %1464 = vperm.xlu0 %2443, %v2740_v34  }
  0x42   :  { %2446 = vset.pattern.permute.xlu1 %v2520_v3 }
  0x43   :  { %1175 = vperm.xlu1 %2446, %v2355_v36  }
  0x45   :  { %1472 = vperm.xlu0 %2443, %v2749_v37  }
  0x47   :  { %2447 = vset.pattern.permute.xlu1 %v2524_v20 }
  0x48   :  { %389 = vperm.xlu1 %2447, %v2657_v50  }
  0x49   :  { %1480 = vperm.xlu0 %2443, %v2754_v41  }
  0x4c   :  { %397 = vperm.xlu1 %2447, %v2670_v56  }
  0x4d   :  { %2450 = vset.pattern.permute.xlu0 %v2524_v20 }
  0x4e   :  { %361 = vperm.xlu0 %2450, %v2606_v26  }
  0x50   :  { %401 = vperm.xlu1 %2447, %v2654_v49  }
  0x52   :  { %373 = vperm.xlu0 %2450, %v2644_v45  }
  0x54   :  { %409 = vperm.xlu1 %2447, %v2664_v53  }
  0x56   :  { %381 = vperm.xlu0 %2450, %v2633_v39  }
  0x58   :  { %417 = vperm.xlu1 %2447, %v2676_v61  }
  0x5a   :  { %393 = vperm.xlu0 %2450, %v2638_v42  }
  0x5c   :  { %2448 = vset.pattern.permute.xlu1 %v2525_v43 }
  0x5d   :  { %459 = vperm.xlu1 %2448, %v2606_v26   ;;  %v2784_v26 = vrot.slane %v1286_v46, %v2589_v17 }
  0x5e   :  { %405 = vperm.xlu0 %2450, %v2679_v62  }
  0x61   :  { %467 = vperm.xlu1 %2448, %v2618_v32   ;;  %v1302_v32 = vcombine.high %v1286_v46, %v1286_v46 }
  0x62   :  { %413 = vperm.xlu0 %2450, %v2690_v4  }
  0x65   :  { %471 = vperm.xlu1 %2448, %v2644_v45   ;;  %v2789_v45 = vrot.slane %v1302_v32, %v2589_v17 }
  0x66   :  { %421 = vperm.xlu0 %2450, %v2704_v9  }
  0x69   :  { %479 = vperm.xlu1 %2448, %v2633_v39   ;;  %v2795_v39 = vrot.slane %v1328_v47, %v2589_v17 }
  0x6a   :  { %1505 = vperm.xlu0 %2450, %v2777_v44  }
  0x6d   :  { %487 = vperm.xlu1 %2448, %v2657_v50   ;;  %v2800_v50 = vrot.slane %v1350_v48, %v2589_v17 }
  0x6e   :  { %1517 = vperm.xlu0 %2450, %v2784_v26  }
  0x71   :  { %495 = vperm.xlu1 %2448, %v2670_v56   ;;  %v2814_v56 = vrot.slane %v1351_v54, %v2589_v17 }
  0x72   :  { %1525 = vperm.xlu0 %2450, %v2789_v45  }
  0x75   :  { %503 = vperm.xlu1 %2448, %v2679_v62  }
  0x76   :  { %1533 = vperm.xlu0 %2450, %v2795_v39  }
  0x79   :  { %511 = vperm.xlu1 %2448, %v2690_v4   ;;  %v2466_v4 = vld [vmem:[%s3991_s3 + $0x8] sm:$0xff]  }
  0x7a   :  { %1541 = vperm.xlu0 %2450, %v2800_v50  }
  0x7d   :  { %519 = vperm.xlu1 %2448, %v2704_v9  }
  0x7e   :  { %1549 = vperm.xlu0 %2450, %v2806_v52  }
  0x81   :  { %v30_v58 = vpop.permute.xlu0 %29  ;;  %2449 = vset.pattern.permute.xlu1 %v2520_v3 }
  0x82   :  { %vm34_vm2 = vcmp.eq.s32.totalorder %v2811_v55, %v30_v58  ;;  %1557 = vperm.xlu0 %2450, %v2814_v56   ;;  %1424 = vperm.xlu1 %2449, %v2777_v44  }
  0x83   :  { %v2331_v1 = vsel %vm34_vm2, 1.0, %v2522_v10 }
  0x85   :  { %v33_v60 = vpop.permute.xlu0 %32 }
  0x86   :  { %vm35_vm3 = vcmp.eq.s32.totalorder %v2811_v55, %v33_v60  ;;  %2452 = vset.pattern.permute.xlu0 %v2525_v43  ;;  %1428 = vperm.xlu1 %2449, %v2823_v59  }
  0x87   :  { %v2332_v3 = vsel %vm35_vm3, 1.0, %v2522_v10  ;;  %463 = vperm.xlu0 %2452, %v2621_v33  }
  0x88   :  { %v40_v62 = vpack.c.bf16 %v2332_v3, %v2331_v1 }
  0x8a   :  { %1436 = vperm.xlu1 %2449, %v2784_v26   ;;  %2400 = vmatmul.mubr.msk.bf16.vlgmr.msra.gmra.mrb[0].mxu0 %vm64_vm4, %v40_v62 }
  0x8b   :  { %2410 = vmatmul.mubr.msk.bf16.vlgmr.msra.gmra.mrb[0].mxu1 %vm64_vm4, %v40_v62  ;;  %475 = vperm.xlu0 %2452, %v2603_v25   ;;  %v2468_v25 = vld [vmem:[%s3991_s3 + $0x10] sm:$0x1f]  }
  0x8c   :  { %v2841_v2 = vpop.permute.xlu0 %295  ;;  %v2843_v33 = vpop.permute.xlu1 %279  ;;  %2414 = vmatpush3.bf16.msra.mxu0 %v2464_v63  ;;  %2424 = vmatpush3.bf16.msra.mxu1 %v2465_v0  ;;  %v1211_v11 = vsel %vm68_vm0, %v2468_v25, 0 }
  0x8d   :  { %2415 = vmatprep.subr.bf16.mxu0 %v2522_v10  ;;  %2425 = vmatprep.subr.bf16.mxu1 %v2522_v10 }
  0x8e   :  { %1444 = vperm.xlu1 %2449, %v2789_v45   ;;  %2419 = vmatprep.mubr.msk.bf16.mxu0 %vm2523_vm1, %v2522_v10 }
  0x8f   :  { %483 = vperm.xlu0 %2452, %v2630_v38   ;;  %2429 = vmatprep.mubr.msk.bf16.mxu1 %vm2523_vm1, %v2522_v10 }
  0x90   :  { %v288_v7 = vpop.permute.xlu0 %287  ;;  %v2863_v9 = vpop.permute.xlu1 %283  ;;  %2416 = vmatpush3.bf16.msra.mxu0 %v2466_v4  ;;  %2426 = vmatpush3.bf16.msra.mxu1 %v2467_v5 }
  0x91   :  { %2417 = vmatprep.subr.bf16.mxu0 %v2522_v10  ;;  %2427 = vmatprep.subr.bf16.mxu1 %v2522_v10 }
  0x92   :  { %1452 = vperm.xlu1 %2449, %v2795_v39  }
  0x93   :  { %491 = vperm.xlu0 %2452, %v2638_v42  }
  0x94   :  { %v304_v38 = vpop.permute.xlu0 %303  ;;  %v2873_v14 = vpop.permute.xlu1 %299  ;;  %2418 = vmatpush3.bf16.msra.mxu0 %v1211_v11  ;;  %2428 = vmatpush3.bf16.msra.mxu1 %v1945_v12 }
  0x96   :  { %1460 = vperm.xlu1 %2449, %v2800_v50  }
  0x97   :  { %499 = vperm.xlu0 %2452, %v2654_v49  }
  0x98   :  { %v2877_v16 = vpop.permute.xlu0 %311  ;;  %v2879_v18 = vpop.permute.xlu1 %291 }
  0x9a   :  { %1468 = vperm.xlu1 %2449, %v2806_v52  }
  0x9b   :  { %507 = vperm.xlu0 %2452, %v2664_v53  }
  0x9c   :  { %v2883_v42 = vpop.permute.xlu0 %319  ;;  %v2885_v19 = vpop.permute.xlu1 %307 }
  0x9e   :  { %1476 = vperm.xlu1 %2449, %v2814_v56  }
  0x9f   :  { %515 = vperm.xlu0 %2452, %v2676_v61  }
  0xa0   :  { %v2889_v22 = vpop.permute.xlu0 %327  ;;  %v2891_v23 = vpop.permute.xlu1 %315 }
  0xa2   :  { %2451 = vset.pattern.permute.xlu1 %v2524_v20 }
  0xa3   :  { %1501 = vperm.xlu1 %2451, %v2700_v8   ;;  %1598 = vperm.xlu0 %2452, %v2700_v8  }
  0xa4   :  { %v2896_v49 = vpop.permute.xlu0 %335  ;;  %v2898_v53 = vpop.permute.xlu1 %323 }
  0xa7   :  { %1509 = vperm.xlu1 %2451, %v2823_v59   ;;  %1610 = vperm.xlu0 %2452, %v2716_v15  }
  0xa8   :  { %v1173_v27 = vpop.permute.xlu0 %1172  ;;  %v2902_v61 = vpop.permute.xlu1 %331 }
  0xa9   :  { %vm1177_vm5 = vcmp.eq.s32.totalorder %v2811_v55, %v1173_v27 }
  0xaa   :  { %v2356_v12 = vsel %vm1177_vm5, 1.0, %v2522_v10 }
  0xab   :  { %1513 = vperm.xlu1 %2451, %v2716_v15   ;;  %1618 = vperm.xlu0 %2452, %v2723_v21   ;;  %v2921_v15 = vld [vmem:[%s3990_s2] sm:$0xff] }
  0xac   :  { %v2906_v20 = vpop.permute.xlu0 %1420  ;;  %v2908_v28 = vpop.permute.xlu1 %339  ;;  %v344_v40 = vmul.f32 %v288_v7, %v2921_v15  ;;  %v346_v58 = vmul.f32 %v2841_v2, %v2921_v15  ;;  %v348_v4 = vmul.f32 %v304_v38, %v2921_v15 }
  0xaf   :  { %1521 = vperm.xlu1 %2451, %v2723_v21   ;;  %1626 = vperm.xlu0 %2452, %v2728_v24   ;;  %v2928_v21 = vld [vmem:[%s3990_s2 + $0x18] sm:$0xff] }
  0xb0   :  { %v2912_v8 = vpop.permute.xlu0 %1432  ;;  %4014 = vst [vmem:[#allocation10_spill] sm:$0xff] %v2928_v21  ;;  %v855_v46 = vmul.f32 %v2928_v21, %v288_v7  ;;  %v857_v1 = vmul.f32 %v2928_v21, %v2841_v2  ;;  %v859_v5 = vmul.f32 %v2928_v21, %v304_v38 }
  0xb1   :  { %v2914_v30 = vpop.permute.xlu1 %365 }
  0xb3   :  { %1529 = vperm.xlu1 %2451, %v2728_v24   ;;  %1634 = vperm.xlu0 %2452, %v2735_v29   ;;  %v2938_v24 = vld [vmem:[%s3990_s2 + $0x20] sm:$0xff] }
  0xb4   :  { %v2923_v31 = vpop.permute.xlu0 %1440  ;;  %4015 = vst [vmem:[#allocation11_spill] sm:$0xff] %v2938_v24 }
  0xb5   :  { %v370_v36 = vpop.permute.xlu1 %369 }
  0xb6   :  { %v426_v32 = vmul.f32 %v2933_v35, %v370_v36  ;;  %v873_v47 = vmul.f32 %v2938_v24, %v370_v36 }
  0xb7   :  { %1537 = vperm.xlu1 %2451, %v2735_v29   ;;  %1642 = vperm.xlu0 %2452, %v2740_v34  }
  0xb8   :  { %v2946_v48 = vadd.f32 %v426_v32, %v344_v40  ;;  %v2948_v51 = vadd.f32 %v873_v47, %v855_v46  ;;  %v2950_v54 = vpop.permute.xlu0 %1448  ;;  %v349_v40 = vmul.f32 %v2885_v19, %v2921_v15 }
  0xb9   :  { %v378_v57 = vpop.permute.xlu1 %377 }
  0xba   :  { %v428_v60 = vmul.f32 %v2933_v35, %v378_v57  ;;  %v875_v3 = vmul.f32 %v2938_v24, %v378_v57  ;;  %v351_v57 = vmul.f32 %v2891_v23, %v2921_v15 }
  0xbb   :  { %1545 = vperm.xlu1 %2451, %v2740_v34   ;;  %1650 = vperm.xlu0 %2452, %v2749_v37  }
  0xbc   :  { %v2960_v29 = vadd.f32 %v428_v60, %v346_v58  ;;  %v2962_v62 = vadd.f32 %v875_v3, %v857_v1  ;;  %v2964_v63 = vpop.permute.xlu0 %1456 }
  0xbd   :  { %v386_v0 = vpop.permute.xlu1 %385 }
  0xbe   :  { %4016 = vst [vmem:[#allocation12_spill] sm:$0xff] %v2962_v62  ;;  %v430_v2 = vmul.f32 %v2933_v35, %v386_v0  ;;  %v877_v25 = vmul.f32 %v2938_v24, %v386_v0 }
  0xbf   :  { %1553 = vperm.xlu1 %2451, %v2749_v37   ;;  %1658 = vperm.xlu0 %2452, %v2754_v41  }
  0xc0   :  { %v2972_v34 = vadd.f32 %v430_v2, %v348_v4  ;;  %v2974_v6 = vadd.f32 %v877_v25, %v859_v5  ;;  %v2976_v7 = vpop.permute.xlu0 %1464  ;;  %v352_v4 = vmul.f32 %v2883_v42, %v2921_v15  ;;  %v863_v5 = vmul.f32 %v2928_v21, %v2883_v42 }
  0xc2   :  { %4017 = vst [vmem:[#allocation13_spill] sm:$0xff] %v2972_v34  ;;  %4018 = vst [vmem:[#allocation14_spill] sm:$0xff] %v2974_v6  ;;  %v1176_v11 = vpop.permute.xlu1 %1175 }
  0xc3   :  { %vm1178_vm6 = vcmp.eq.s32.totalorder %v2811_v55, %v1176_v11  ;;  %1561 = vperm.xlu1 %2451, %v2754_v41   ;;  %v860_v55 = vmul.f32 %v2928_v21, %v2885_v19  ;;  %v862_v19 = vmul.f32 %v2928_v21, %v2891_v23 }
  0xc4   :  { %v2357_v38 = vsel %vm1178_vm6, 1.0, %v2522_v10  ;;  %v2983_v37 = vpop.permute.xlu0 %1472 }
  0xc5   :  { %v1183_v36 = vpack.c.bf16 %v2357_v38, %v2356_v12  ;;  %v354_v38 = vmul.f32 %v2889_v22, %v2921_v15 }
  0xc7   :  { %2453 = vset.pattern.permute.xlu1 %v2525_v43  ;;  %v390_v46 = vpop.permute.xlu1 %389  ;;  %2420 = vmatmul.mubr.msk.bf16.vlgmr.msra.gmra.mrb[4].mxu0 %vm64_vm4, %v1183_v36 }
  0xc8   :  { %v431_v41 = vmul.f32 %v2933_v35, %v390_v46  ;;  %v878_v27 = vmul.f32 %v2938_v24, %v390_v46  ;;  %2430 = vmatmul.mubr.msk.bf16.vlgmr.msra.gmra.mrb[4].mxu1 %vm64_vm4, %v1183_v36  ;;  %v2994_v10 = vpop.permute.xlu0 %1480  ;;  %1602 = vperm.xlu1 %2453, %v2777_v44   ;;  %v865_v36 = vmul.f32 %v2928_v21, %v2889_v22 }
  0xc9   :  { %4019 = vst [vmem:[#allocation15_spill] sm:$0xff] %v2994_v10 }
  0xca   :  { %v2997_v32 = vadd.f32 %v431_v41, %v349_v40  ;;  %v2999_v47 = vadd.f32 %v878_v27, %v860_v55  ;;  %v356_v27 = vmul.f32 %v2896_v49, %v2921_v15 }
  0xcb   :  { %v398_v43 = vpop.permute.xlu1 %397 }
  0xcc   :  { %v433_v58 = vmul.f32 %v2933_v35, %v398_v43  ;;  %v880_v1 = vmul.f32 %v2938_v24, %v398_v43  ;;  %1606 = vperm.xlu1 %2453, %v2823_v59   ;;  %v867_v43 = vmul.f32 %v2928_v21, %v2896_v49 }
  0xcd   :  { %v3008_v60 = vpop.permute.xlu0 %361 }
  0xce   :  { %v3010_v44 = vadd.f32 %v433_v58, %v351_v57  ;;  %v3012_v3 = vadd.f32 %v880_v1, %v862_v19  ;;  %v861_v19 = vmul.f32 %v2928_v21, %v2877_v16 }
  0xcf   :  { %v402_v0 = vpop.permute.xlu1 %401 }
  0xd0   :  { %v434_v23 = vmul.f32 %v2933_v35, %v402_v0  ;;  %v881_v2 = vmul.f32 %v2938_v24, %v402_v0  ;;  %1614 = vperm.xlu1 %2453, %v2784_v26  }
  0xd1   :  { %v3021_v59 = vpop.permute.xlu0 %373 }
  0xd2   :  { %v3023_v25 = vadd.f32 %v434_v23, %v352_v4  ;;  %v3025_v11 = vadd.f32 %v881_v2, %v863_v5 }
  0xd3   :  { %v410_v12 = vpop.permute.xlu1 %409 }
  0xd4   :  { %4020 = vst [vmem:[#allocation16_spill] sm:$0xff] %v3023_v25  ;;  %4021 = vst [vmem:[#allocation17_spill] sm:$0xff] %v3025_v11  ;;  %v436_v42 = vmul.f32 %v2933_v35, %v410_v12  ;;  %v883_v40 = vmul.f32 %v2938_v24, %v410_v12  ;;  %1622 = vperm.xlu1 %2453, %v2789_v45   ;;  %v350_v45 = vmul.f32 %v2877_v16, %v2921_v15 }
  0xd5   :  { %v3034_v26 = vpop.permute.xlu0 %381  ;;  %v353_v16 = vmul.f32 %v2898_v53, %v2921_v15  ;;  %v864_v12 = vmul.f32 %v2928_v21, %v2898_v53 }
  0xd6   :  { %v3036_v46 = vadd.f32 %v436_v42, %v354_v38  ;;  %v3038_v55 = vadd.f32 %v883_v40, %v865_v36 }
  0xd7   :  { %v418_v41 = vpop.permute.xlu1 %417 }
  0xd8   :  { %4022 = vst [vmem:[#allocation18_spill] sm:$0xff] %v3036_v46  ;;  %4023 = vst [vmem:[#allocation19_spill] sm:$0xff] %v3038_v55  ;;  %v438_v22 = vmul.f32 %v2933_v35, %v418_v41  ;;  %v885_v57 = vmul.f32 %v2938_v24, %v418_v41  ;;  %1630 = vperm.xlu1 %2453, %v2795_v39  }
  0xd9   :  { %v394_v58 = vpop.permute.xlu0 %393 }
  0xda   :  { %v3051_v1 = vadd.f32 %v438_v22, %v356_v27  ;;  %v3053_v0 = vadd.f32 %v885_v57, %v867_v43  ;;  %v432_v4 = vmul.f32 %v2933_v35, %v394_v58  ;;  %v879_v49 = vmul.f32 %v2938_v24, %v394_v58 }
  0xdb   :  { %v866_v27 = vmul.f32 %v2928_v21, %v2902_v61 }
  0xdc   :  { %4024 = vst [vmem:[#allocation20_spill] sm:$0xff] %v3051_v1  ;;  %4025 = vst [vmem:[#allocation21_spill] sm:$0xff] %v3053_v0  ;;  %v3057_v5 = vadd.f32 %v432_v4, %v350_v45  ;;  %v3059_v23 = vadd.f32 %v879_v49, %v861_v19  ;;  %1638 = vperm.xlu1 %2453, %v2800_v50   ;;  %v3062_v39 = vpop.permute.xlu1 %459 }
  0xdd   :  { %v406_v2 = vpop.permute.xlu0 %405 }
  0xde   :  { %4026 = vst [vmem:[#allocation22_spill] sm:$0xff] %v3057_v5  ;;  %4027 = vst [vmem:[#allocation23_spill] sm:$0xff] %v3059_v23  ;;  %v435_v38 = vmul.f32 %v2933_v35, %v406_v2  ;;  %v882_v36 = vmul.f32 %v2938_v24, %v406_v2 }
  0xe0   :  { %v3070_v42 = vadd.f32 %v435_v38, %v353_v16  ;;  %v3072_v40 = vadd.f32 %v882_v36, %v864_v12  ;;  %1646 = vperm.xlu1 %2453, %v2806_v52   ;;  %v3075_v50 = vpop.permute.xlu1 %467  ;;  %v868_v52 = vmul.f32 %v2928_v21, %v2908_v28 }
  0xe1   :  { %v3077_v41 = vpop.permute.xlu0 %413 }
  0xe2   :  { %v884_v53 = vmul.f32 %v2938_v24, %v3077_v41 }
  0xe4   :  { %v3083_v43 = vadd.f32 %v884_v53, %v866_v27  ;;  %1654 = vperm.xlu1 %2453, %v2814_v56   ;;  %v3086_v22 = vpop.permute.xlu1 %471 }
  0xe5   :  { %v3088_v57 = vpop.permute.xlu0 %421 }
  0xe6   :  { %v886_v45 = vmul.f32 %v2938_v24, %v3088_v57 }
  0xe8   :  { %v3094_v19 = vadd.f32 %v886_v45, %v868_v52  ;;  %v3096_v58 = vpop.permute.xlu1 %479 }
  0xe9   :  { %v1506_v56 = vpop.permute.xlu0 %1505 }
  0xea   :  { %v1565_v36 = vmul.f32 %v2933_v35, %v1506_v56  ;;  %v2007_v27 = vmul.f32 %v2938_v24, %v1506_v56 }
  0xec   :  { %v3098_v4 = vpop.permute.xlu1 %487 }
  0xed   :  { %v1518_v12 = vpop.permute.xlu0 %1517 }
  0xee   :  { %v1568_v55 = vmul.f32 %v2933_v35, %v1518_v12  ;;  %v2010_v46 = vmul.f32 %v2938_v24, %v1518_v12 }
  0xf0   :  { %v3100_v49 = vpop.permute.xlu1 %495 }
  0xf1   :  { %v1526_v17 = vpop.permute.xlu0 %1525 }
  0xf2   :  { %v1570_v5 = vmul.f32 %v2933_v35, %v1526_v17 }
  0xf4   :  { %v3102_v2 = vpop.permute.xlu1 %503 }
  0xf5   :  { %v1534_v11 = vpop.permute.xlu0 %1533 }
  0xf6   :  { %v2014_v6 = vmul.f32 %v2938_v24, %v1534_v11 }
  0xf8   :  { %v3104_v16 = vpop.permute.xlu1 %511 }
  0xf9   :  { %v1542_v12 = vpop.permute.xlu0 %1541 }
  0xfc   :  { %v3106_v38 = vpop.permute.xlu1 %519 }
 0x101   :  { %v1425_v53 = vpop.permute.xlu1 %1424 }
 0x102   :  { %v1484_v52 = vmul.f32 %v1425_v53, %v2921_v15  ;;  %v1990_v45 = vmul.f32 %v2928_v21, %v1425_v53  ;;  %v2012_v53 = vmul.f32 %v2938_v24, %v1526_v17 }
 0x104   :  { %v3112_v0 = vadd.f32 %v1565_v36, %v1484_v52  ;;  %v3114_v13 = vadd.f32 %v2007_v27, %v1990_v45 }
 0x105   :  { %v3116_v1 = vpop.permute.xlu1 %1428 }
 0x106   :  { %4028 = vst [vmem:[#allocation24_spill] sm:$0xff] %v3112_v0  ;;  %4029 = vst [vmem:[#allocation25_spill] sm:$0xff] %v3114_v13  ;;  %v1572_v0 = vmul.f32 %v2933_v35, %v1534_v11 }
 0x109   :  { %v1437_v25 = vpop.permute.xlu1 %1436 }
 0x10a   :  { %v1487_v56 = vmul.f32 %v1437_v25, %v2921_v15  ;;  %v1993_v23 = vmul.f32 %v2928_v21, %v1437_v25 }
 0x10c   :  { %v3124_v36 = vadd.f32 %v1568_v55, %v1487_v56  ;;  %v3126_v27 = vadd.f32 %v2010_v46, %v1993_v23  ;;  %v1574_v55 = vmul.f32 %v2933_v35, %v1542_v12  ;;  %v2016_v23 = vmul.f32 %v2938_v24, %v1542_v12 }
 0x10d   :  { %v1445_v52 = vpop.permute.xlu1 %1444 }
 0x10e   :  { %4030 = vst [vmem:[#allocation26_spill] sm:$0xff] %v3124_v36  ;;  %4031 = vst [vmem:[#allocation27_spill] sm:$0xff] %v3126_v27  ;;  %v1489_v45 = vmul.f32 %v1445_v52, %v2921_v15  ;;  %v1995_v13 = vmul.f32 %v2928_v21, %v1445_v52  ;;  %v1550_v27 = vpop.permute.xlu0 %1549 }
 0x110   :  { %v3132_v34 = vadd.f32 %v1570_v5, %v1489_v45  ;;  %v3134_v25 = vadd.f32 %v2012_v53, %v1995_v13  ;;  %v1576_v5 = vmul.f32 %v2933_v35, %v1550_v27  ;;  %v2018_v53 = vmul.f32 %v2938_v24, %v1550_v27 }
 0x111   :  { %v1453_v62 = vpop.permute.xlu1 %1452 }
 0x112   :  { %4032 = vst [vmem:[#allocation28_spill] sm:$0xff] %v3132_v34  ;;  %4033 = vst [vmem:[#allocation29_spill] sm:$0xff] %v3134_v25  ;;  %v1491_v17 = vmul.f32 %v1453_v62, %v2921_v15  ;;  %v1997_v46 = vmul.f32 %v2928_v21, %v1453_v62  ;;  %v1558_v12 = vpop.permute.xlu0 %1557 }
 0x114   :  { %v3140_v56 = vadd.f32 %v1572_v0, %v1491_v17  ;;  %v3142_v52 = vadd.f32 %v2014_v6, %v1997_v46  ;;  %v1578_v17 = vmul.f32 %v2933_v35, %v1558_v12  ;;  %v2020_v46 = vmul.f32 %v2938_v24, %v1558_v12 }
 0x115   :  { %v1461_v36 = vpop.permute.xlu1 %1460 }
 0x116   :  { %4034 = vst [vmem:[#allocation30_spill] sm:$0xff] %v3140_v56  ;;  %4035 = vst [vmem:[#allocation31_spill] sm:$0xff] %v3142_v52  ;;  %v1493_v11 = vmul.f32 %v1461_v36, %v2921_v15  ;;  %v1999_v13 = vmul.f32 %v2928_v21, %v1461_v36 }
 0x118   :  { %v3148_v45 = vadd.f32 %v1574_v55, %v1493_v11  ;;  %v3150_v62 = vadd.f32 %v2016_v23, %v1999_v13  ;;  %v3166_v13 = vpop.permute.xlu0 %463 }
 0x119   :  { %v1469_v25 = vpop.permute.xlu1 %1468 }
 0x11a   :  { %4036 = vst [vmem:[#allocation32_spill] sm:$0xff] %v3148_v45  ;;  %4037 = vst [vmem:[#allocation33_spill] sm:$0xff] %v3150_v62  ;;  %v1495_v0 = vmul.f32 %v1469_v25, %v2921_v15  ;;  %v2001_v6 = vmul.f32 %v2928_v21, %v1469_v25 }
 0x11c   :  { %v3156_v52 = vadd.f32 %v1576_v5, %v1495_v0  ;;  %v3158_v36 = vadd.f32 %v2018_v53, %v2001_v6  ;;  %v3168_v25 = vpop.permute.xlu0 %475  ;;  %v342_v53 = vmul.f32 %v2843_v33, %v2921_v15  ;;  %v425_v0 = vmul.f32 %v2933_v35, %v2914_v30 }
 0x11d   :  { %v1477_v56 = vpop.permute.xlu1 %1476  ;;  %v872_v6 = vmul.f32 %v2938_v24, %v2914_v30  ;;  %v355_v30 = vmul.f32 %v2902_v61, %v2921_v15  ;;  %v3218_v61 = vmul.f32 %v2928_v21, %v2912_v8 }
 0x11e   :  { %4038 = vst [vmem:[#allocation34_spill] sm:$0xff] %v3156_v52  ;;  %4039 = vst [vmem:[#allocation35_spill] sm:$0xff] %v3158_v36  ;;  %v1497_v27 = vmul.f32 %v1477_v56, %v2921_v15  ;;  %v2003_v55 = vmul.f32 %v2928_v21, %v1477_v56  ;;  %v853_v56 = vmul.f32 %v2928_v21, %v2843_v33 }
 0x11f   :  { %v345_v33 = vmul.f32 %v2879_v18, %v2921_v15  ;;  %v357_v52 = vmul.f32 %v2908_v28, %v2921_v15  ;;  %4048 = vst [vmem:[#allocation44_spill] sm:$0xff] %v3218_v61  ;;  %v3235_v28 = vld [vmem:[%s3990_s2 + $0x10] sm:$0xff]  ;;  %v3276_v61 = vmul.f32 %v2976_v7, %v2921_v15 }
 0x120   :  { %v3162_v23 = vadd.f32 %v1578_v17, %v1497_v27  ;;  %v3164_v11 = vadd.f32 %v2020_v46, %v2003_v55  ;;  %v3172_v12 = vpop.permute.xlu0 %483  ;;  %v343_v17 = vmul.f32 %v2863_v9, %v2921_v15  ;;  %v854_v46 = vmul.f32 %v2928_v21, %v2863_v9  ;;  %4051 = vst [vmem:[#allocation47_spill] sm:$0xff] %v3235_v28 }
 0x121   :  { %v347_v27 = vmul.f32 %v2873_v14, %v2921_v15  ;;  %v858_v55 = vmul.f32 %v2928_v21, %v2873_v14  ;;  %v3208_v14 = vmul.f32 %v2928_v21, %v2906_v20  ;;  %4056 = vst [vmem:[#allocation52_spill] sm:$0xff] %v3276_v61  ;;  %v3294_v61 = vmul.f32 %v2928_v21, %v2983_v37 }
 0x122   :  { %4040 = vst [vmem:[#allocation36_spill] sm:$0xff] %v3162_v23  ;;  %4041 = vst [vmem:[#allocation37_spill] sm:$0xff] %v3164_v11  ;;  %v3170_v62 = vpop.permute.xlu1 %1501  ;;  %v856_v11 = vmul.f32 %v2928_v21, %v2879_v18  ;;  %v3200_v23 = vmul.f32 %v2906_v20, %v2921_v15  ;;  %v3214_v18 = vmul.f32 %v2912_v8, %v2921_v15  ;;  %v3240_v8 = vld [vmem:[%s3990_s2 + $0x28] sm:$0xff] }
 0x123   :  { %4042 = vst [vmem:[#allocation38_spill] sm:$0xff] %v3170_v62  ;;  %4046 = vst [vmem:[#allocation42_spill] sm:$0xff] %v3208_v14  ;;  %v3220_v45 = vadd.f32 %v425_v0, %v343_v17  ;;  %v3222_v34 = vadd.f32 %v872_v6, %v854_v46  ;;  %v3230_v20 = vmul.f32 %v2928_v21, %v2923_v31 }
 0x124   :  { %4044 = vst [vmem:[#allocation40_spill] sm:$0xff] %v3200_v23  ;;  %v3202_v9 = vpop.permute.xlu0 %491  ;;  %4047 = vst [vmem:[#allocation43_spill] sm:$0xff] %v3214_v18  ;;  %v3244_v0 = vmul.f32 %v2950_v54, %v2921_v15  ;;  %v3248_v6 = vmul.f32 %v2928_v21, %v2950_v54  ;;  %v871_v17 = vmul.f32 %v2938_v24, %v3008_v60 }
 0x125   :  { %4050 = vst [vmem:[#allocation46_spill] sm:$0xff] %v3230_v20  ;;  %v3256_v46 = vmul.f32 %v2964_v63, %v2921_v15  ;;  %v427_v20 = vmul.f32 %v2933_v35, %v3021_v59  ;;  %v429_v54 = vmul.f32 %v2933_v35, %v3034_v26  ;;  %4060 = vst [vmem:[#allocation56_spill] sm:$0xff] %v3294_v61 }
 0x126   :  { %v3174_v5 = vpop.permute.xlu1 %1509  ;;  %4052 = vst [vmem:[#allocation48_spill] sm:$0xff] %v3244_v0  ;;  %4053 = vst [vmem:[#allocation49_spill] sm:$0xff] %v3248_v6  ;;  %v874_v0 = vmul.f32 %v2938_v24, %v3021_v59  ;;  %v3266_v6 = vmul.f32 %v2928_v21, %v2964_v63  ;;  %v3280_v59 = vmul.f32 %v2928_v21, %v2976_v7 }
 0x127   :  { %4043 = vst [vmem:[#allocation39_spill] sm:$0xff] %v3174_v5  ;;  %4054 = vst [vmem:[#allocation50_spill] sm:$0xff] %v3256_v46  ;;  %v905_v46 = vmul.f32 %v3240_v8, %v3062_v39  ;;  %v524_v63 = vmul.f32 %v3235_v28, %v3075_v50  ;;  %v887_v7 = vadd.f32 %v871_v17, %v853_v56 }
 0x128   :  { %4055 = vst [vmem:[#allocation51_spill] sm:$0xff] %v3266_v6  ;;  %4057 = vst [vmem:[#allocation53_spill] sm:$0xff] %v3280_v59  ;;  %v500_v6 = vpop.permute.xlu0 %499  ;;  %v3298_v59 = vmul.f32 %v2994_v10, %v2921_v15  ;;  %v443_v14 = vadd.f32 %v427_v20, %v345_v33  ;;  %v890_v23 = vadd.f32 %v874_v0, %v856_v11 }
 0x129   :  { %v525_v56 = vmul.f32 %v3235_v28, %v3086_v22  ;;  %v908_v11 = vmul.f32 %v3240_v8, %v3086_v22  ;;  %v914_v22 = vmul.f32 %v3240_v8, %v3100_v49  ;;  %v535_v20 = vmul.f32 %v3235_v28, %v3104_v16 }
 0x12a   :  { %v3204_v36 = vpop.permute.xlu1 %1513  ;;  %4061 = vst [vmem:[#allocation57_spill] sm:$0xff] %v3298_v59  ;;  %v537_v0 = vmul.f32 %v3235_v28, %v3106_v38 }
 0x12b   :  { %4045 = vst [vmem:[#allocation41_spill] sm:$0xff] %v3204_v36  ;;  %v3226_v36 = vmul.f32 %v2923_v31, %v2921_v15  ;;  %v424_v31 = vmul.f32 %v2933_v35, %v3008_v60  ;;  %v876_v60 = vmul.f32 %v2938_v24, %v3034_v26  ;;  %v907_v26 = vmul.f32 %v3240_v8, %v3075_v50 }
 0x12c   :  { %v445_v50 = vadd.f32 %v429_v54, %v347_v27  ;;  %v531_v27 = vmul.f32 %v3235_v28, %v3100_v49  ;;  %v3342_v49 = vadd.f32 %v525_v56, %v443_v14  ;;  %v3344_v17 = vadd.f32 %v908_v11, %v890_v23 }
 0x12d   :  { %4049 = vst [vmem:[#allocation45_spill] sm:$0xff] %v3226_v36  ;;  %v522_v36 = vmul.f32 %v3235_v28, %v3062_v39  ;;  %v3290_v39 = vmul.f32 %v2983_v37, %v2921_v15  ;;  %v440_v5 = vadd.f32 %v424_v31, %v342_v53  ;;  %v892_v24 = vadd.f32 %v876_v60, %v858_v55  ;;  %v508_v55 = vpop.permute.xlu0 %507 }
 0x12e   :  { %v3286_v18 = vpop.permute.xlu1 %1521  ;;  %v3307_v37 = vadd.f32 %v524_v63, %v2946_v48  ;;  %v3310_v53 = vadd.f32 %v907_v26, %v2948_v51  ;;  %v529_v48 = vmul.f32 %v3235_v28, %v3098_v4  ;;  %v912_v51 = vmul.f32 %v3240_v8, %v3098_v4 }
 0x12f   :  { %4058 = vst [vmem:[#allocation54_spill] sm:$0xff] %v3286_v18  ;;  %4059 = vst [vmem:[#allocation55_spill] sm:$0xff] %v3290_v39  ;;  %v3300_v62 = vadd.f32 %v522_v36, %v440_v5  ;;  %v3302_v18 = vadd.f32 %v905_v46, %v887_v7  ;;  %v437_v39 = vmul.f32 %v2933_v35, %v3077_v41 }
 0x130   :  { %v439_v36 = vmul.f32 %v2933_v35, %v3088_v57  ;;  %v527_v5 = vmul.f32 %v3235_v28, %v3096_v58  ;;  %v910_v41 = vmul.f32 %v3240_v8, %v3096_v58  ;;  %v533_v57 = vmul.f32 %v3235_v28, %v3102_v2 }
 0x131   :  { %v916_v58 = vmul.f32 %v3240_v8, %v3102_v2  ;;  %v918_v4 = vmul.f32 %v3240_v8, %v3104_v16  ;;  %v453_v31 = vadd.f32 %v437_v39, %v355_v30  ;;  %v920_v46 = vmul.f32 %v3240_v8, %v3106_v38 }
 0x132   :  { %v3332_v33 = vpop.permute.xlu1 %1529  ;;  %v455_v54 = vadd.f32 %v439_v36, %v357_v52  ;;  %v3348_v60 = vadd.f32 %v527_v5, %v445_v50  ;;  %v3350_v2 = vadd.f32 %v910_v41, %v892_v24  ;;  %v3353_v63 = vadd.f32 %v529_v48, %v2997_v32 }
 0x133   :  { %4062 = vst [vmem:[#allocation58_spill] sm:$0xff] %v3332_v33  ;;  %v3356_v16 = vadd.f32 %v912_v51, %v2999_v47  ;;  %v3359_v30 = vadd.f32 %v531_v27, %v3010_v44  ;;  %v3362_v23 = vadd.f32 %v914_v22, %v3012_v3  ;;  %v3365_v14 = vadd.f32 %v533_v57, %v3070_v42  ;;  %v4068_v51 = vld [vmem:[#allocation12_spill] sm:$0xff]  ;;  %v4069_v27 = vld [vmem:[#allocation13_spill] sm:$0xff] }
 0x134   :  { %v3368_v38 = vadd.f32 %v916_v58, %v3072_v40  ;;  %v3370_v24 = vadd.f32 %v535_v20, %v453_v31  ;;  %v3373_v32 = vadd.f32 %v918_v4, %v3083_v43  ;;  %v3375_v52 = vadd.f32 %v537_v0, %v455_v54  ;;  %v516_v40 = vpop.permute.xlu0 %515  ;;  %v4073_v4 = vld [vmem:[#allocation16_spill] sm:$0xff]  ;;  %v4074_v0 = vld [vmem:[#allocation17_spill] sm:$0xff] }
 0x135   :  { %v3378_v47 = vadd.f32 %v920_v46, %v3094_v19  ;;  %v523_v44 = vmul.f32 %v3235_v28, %v3166_v13  ;;  %v906_v3 = vmul.f32 %v3240_v8, %v3166_v13  ;;  %v526_v42 = vmul.f32 %v3235_v28, %v3168_v25  ;;  %v4075_v46 = vld [vmem:[#allocation18_spill] sm:$0xff] }
 0x136   :  { %4063 = vst [vmem:[#allocation59_spill] sm:$0xff] %v3373_v32  ;;  %v3386_v26 = vpop.permute.xlu1 %1537  ;;  %v909_v43 = vmul.f32 %v3240_v8, %v3168_v25  ;;  %v528_v39 = vmul.f32 %v3235_v28, %v3172_v12  ;;  %v911_v19 = vmul.f32 %v3240_v8, %v3172_v12  ;;  %v530_v7 = vmul.f32 %v3235_v28, %v3202_v9 }
 0x137   :  { %4064 = vst [vmem:[#allocation60_spill] sm:$0xff] %v3378_v47  ;;  %4065 = vst [vmem:[#allocation61_spill] sm:$0xff] %v3386_v26  ;;  %v913_v13 = vmul.f32 %v3240_v8, %v3202_v9  ;;  %v532_v50 = vmul.f32 %v3235_v28, %v500_v6  ;;  %v915_v56 = vmul.f32 %v3240_v8, %v500_v6  ;;  %v4086_v26 = vld [vmem:[#allocation9_spill] sm:$0xff] }
 0x138   :  { %v534_v11 = vmul.f32 %v3235_v28, %v508_v55  ;;  %v3403_v25 = vmul.f32 %v3116_v1, %v2921_v15  ;;  %v3407_v36 = vmul.f32 %v2928_v21, %v3116_v1  ;;  %v917_v12 = vmul.f32 %v3240_v8, %v508_v55  ;;  %v4070_v1 = vld [vmem:[#allocation14_spill] sm:$0xff]  ;;  %v3427_v20 = vpop.permute.xlu0 %1598 }
 0x139   :  { %v536_v5 = vmul.f32 %v3235_v28, %v516_v40  ;;  %v539_v9 = vadd.f32 %v523_v44, %v3220_v45  ;;  %v3413_v41 = vadd.f32 %v906_v3, %v3222_v34  ;;  %v542_v6 = vadd.f32 %v526_v42, %v2960_v29  ;;  %v4071_v55 = vld [vmem:[#allocation22_spill] sm:$0xff]  ;;  %v4072_v45 = vld [vmem:[#allocation23_spill] sm:$0xff] }
 0x13a   :  { %4066 = vst [vmem:[#allocation62_spill] sm:$0xff] %v3403_v25  ;;  %4067 = vst [vmem:[#allocation63_spill] sm:$0xff] %v3407_v36  ;;  %v919_v48 = vmul.f32 %v3240_v8, %v516_v40  ;;  %v3418_v15 = vadd.f32 %v909_v43, %v4068_v51  ;;  %v544_v22 = vadd.f32 %v528_v39, %v4069_v27  ;;  %v3441_v44 = vpop.permute.xlu1 %1545  ;;  %v4077_v42 = vld [vmem:[#allocation19_spill] sm:$0xff]  ;;  %v4078_v43 = vld [vmem:[#allocation20_spill] sm:$0xff] }
 0x13b   :  { %v3422_v57 = vadd.f32 %v911_v19, %v4070_v1  ;;  %v3425_v58 = vadd.f32 %v530_v7, %v4071_v55  ;;  %v3430_v34 = vadd.f32 %v913_v13, %v4072_v45  ;;  %v3433_v29 = vadd.f32 %v532_v50, %v4073_v4  ;;  %4076 = vst [vmem:[#allocation12_spill] sm:$0xff] %v3441_v44  ;;  %v4079_v7 = vld [vmem:[#allocation8_spill] sm:$0xff] }
 0x13c   :  { %v3436_v31 = vadd.f32 %v915_v56, %v4074_v0  ;;  %v3439_v54 = vadd.f32 %v534_v11, %v4075_v46  ;;  %v3444_v40 = vadd.f32 %v917_v12, %v4077_v42  ;;  %v3447_v39 = vadd.f32 %v536_v5, %v4078_v43  ;;  %v4080_v56 = vld [vmem:[#allocation21_spill] sm:$0xff]  ;;  %v4082_v11 = vld [vmem:[#allocation38_spill] sm:$0xff]  ;;  %v4083_v5 = vld [vmem:[#allocation11_spill] sm:$0xff] }
 0x13d   :  { %v3451_v27 = vadd.f32 %v919_v48, %v4080_v56  ;;  %v3455_v1 = vmul.f32 %v2933_v35, %v4082_v11  ;;  %v3460_v4 = vmul.f32 %v4083_v5, %v4082_v11  ;;  %v3470_v43 = vmul.f32 %v3235_v28, %v3427_v20 }
 0x13e   :  { %v3478_v44 = vpop.permute.xlu1 %1553 }
 0x13f   :  { %4081 = vst [vmem:[#allocation13_spill] sm:$0xff] %v3451_v27  ;;  %4084 = vst [vmem:[#allocation14_spill] sm:$0xff] %v3470_v43 }
 0x140   :  { %4085 = vst [vmem:[#allocation22_spill] sm:$0xff] %v3478_v44 }
 0x15d   :  { %v106_v3 = vpop.f32.mrb[0].mxu0 }
 0x15e   :  { %v556_v19 = vcombine.high %v106_v3, %v106_v3  ;;  %v563_v13 = vrot.slane %v106_v3, %v4079_v7  ;;  %v844_v50 = vpop.f32.mrb[0].mxu1  ;;  %v2401_v51 = vpop.f32.mrb[1].mxu0 }
 0x15f   :  { %v939_v55 = vcombine.high %v844_v50, %v844_v50  ;;  %v946_v12 = vrot.slane %v844_v50, %v4079_v7  ;;  %v2411_v45 = vpop.f32.mrb[1].mxu1  ;;  %v3464_v42 = vpop.f32.mrb[2].mxu0 }
 0x160   :  { %v570_v0 = vrot.slane %v556_v19, %v4079_v7  ;;  %v571_v46 = vcombine.high %v563_v13, %v563_v13  ;;  %v579_v3 = vrot.slane %v563_v13, %v4079_v7  ;;  %v3466_v48 = vpop.f32.mrb[2].mxu1  ;;  %v2402_v11 = vpop.f32.mrb[3].mxu0 }
 0x161   :  { %v953_v50 = vrot.slane %v939_v55, %v4079_v7  ;;  %v954_v51 = vcombine.high %v946_v12, %v946_v12  ;;  %v3474_v56 = vrot.slane %v946_v12, %v4079_v7  ;;  %v2412_v45 = vpop.f32.mrb[3].mxu1 }
 0x162   :  { %v572_v19 = vcombine.high %v570_v0, %v570_v0  ;;  %v586_v59 = vrot.slane %v570_v0, %v4079_v7  ;;  %v593_v13 = vrot.slane %v571_v46, %v4079_v7  ;;  %v601_v61 = vcombine.high %v579_v3, %v579_v3 }
 0x163   :  { %v657_v33 = vrot.slane %v579_v3, %v4086_v26  ;;  %v955_v36 = vcombine.high %v953_v50, %v953_v50  ;;  %v969_v25 = vrot.slane %v953_v50, %v4079_v7  ;;  %v976_v55 = vrot.slane %v954_v51, %v4079_v7 }
 0x164   :  { %v600_v12 = vrot.slane %v572_v19, %v4079_v7  ;;  %v602_v28 = vcombine.high %v586_v59, %v586_v59  ;;  %v603_v11 = vcombine.high %v593_v13, %v593_v13  ;;  %v661_v45 = vrot.slane %v593_v13, %v4086_v26 }
 0x165   :  { %v665_v0 = vrot.slane %v601_v61, %v4086_v26  ;;  %v673_v46 = vrot.slane %v586_v59, %v4086_v26  ;;  %v734_v43 = vadd.f32 %v657_v33, %v3300_v62  ;;  %v983_v44 = vrot.slane %v955_v36, %v4079_v7  ;;  %v3496_v36 = vpop.permute.xlu1 %1561 }
 0x166   :  { %v604_v3 = vcombine.high %v600_v12, %v600_v12  ;;  %v669_v21 = vrot.slane %v603_v11, %v4086_v26  ;;  %v677_v50 = vrot.slane %v600_v12, %v4086_v26  ;;  %v681_v51 = vrot.slane %v602_v28, %v4086_v26  ;;  %v3502_v12 = vpop.permute.xlu0 %1610 }
 0x167   :  { %v735_v19 = vadd.f32 %v661_v45, %v539_v9  ;;  %v736_v10 = vadd.f32 %v665_v0, %v3307_v37  ;;  %v738_v47 = vadd.f32 %v673_v46, %v542_v6  ;;  %v750_v13 = vpack.c.bf16 %v734_v43, %v734_v43 }
 0x168   :  { %v685_v61 = vrot.slane %v604_v3, %v4086_v26  ;;  %v737_v59 = vadd.f32 %v669_v21, %v3342_v49  ;;  %v739_v62 = vadd.f32 %v677_v50, %v3348_v60  ;;  %v740_v33 = vadd.f32 %v681_v51, %v544_v22 }
 0x169   :  { %v751_v27 = vpack.c.bf16 %v735_v19, %v735_v19  ;;  %v752_v11 = vpack.c.bf16 %v736_v10, %v736_v10  ;;  %v754_v32 = vpack.c.bf16 %v738_v47, %v738_v47  ;;  %767 = vst.msk [vmem:[#allocation2] sm:$0xf] %vm766_vm7, %v750_v13  ;;  %v984_v28 = vcombine.high %v3474_v56, %v3474_v56  ;;  %v3524_v51 = vpop.permute.xlu1 %1602 }
 0x16a   :  { %v741_v37 = vadd.f32 %v685_v61, %v3353_v63  ;;  %v753_v9 = vpack.c.bf16 %v737_v59, %v737_v59  ;;  %v755_v6 = vpack.c.bf16 %v739_v62, %v739_v62  ;;  %v756_v43 = vpack.c.bf16 %v740_v33, %v740_v33  ;;  %v3530_v33 = vpop.permute.xlu0 %1618 }
 0x16b   :  { %768 = vst.msk [vmem:[#allocation2 + $0x8] sm:$0xf] %vm766_vm7, %v751_v27  ;;  %769 = vst.msk [vmem:[#allocation2 + $0x10] sm:$0xf] %vm766_vm7, %v752_v11  ;;  %v985_v21 = vcombine.high %v969_v25, %v969_v25  ;;  %v986_v10 = vcombine.high %v976_v55, %v976_v55  ;;  %v987_v49 = vcombine.high %v983_v44, %v983_v44 }
 0x16c   :  { %771 = vst.msk [vmem:[#allocation2 + $0x20] sm:$0xf] %vm766_vm7, %v754_v32  ;;  %v1040_v60 = vrot.slane %v3474_v56, %v4086_v26  ;;  %v757_v47 = vpack.c.bf16 %v741_v37, %v741_v37  ;;  %770 = vst.msk [vmem:[#allocation2 + $0x18] sm:$0xf] %vm766_vm7, %v753_v9  ;;  %v1044_v63 = vrot.slane %v976_v55, %v4086_v26 }
 0x16d   :  { %772 = vst.msk [vmem:[#allocation2 + $0x28] sm:$0xf] %vm766_vm7, %v755_v6  ;;  %773 = vst.msk [vmem:[#allocation2 + $0x30] sm:$0xf] %vm766_vm7, %v756_v43  ;;  %v1048_v22 = vrot.slane %v984_v28, %v4086_v26  ;;  %v1056_v27 = vrot.slane %v969_v25, %v4086_v26  ;;  %v1052_v32 = vrot.slane %v986_v10, %v4086_v26  ;;  %v4087_v28 = vld [vmem:[#allocation40_spill] sm:$0xff] }
 0x16e   :  { %v1060_v45 = vrot.slane %v983_v44, %v4086_v26  ;;  %v1064_v0 = vrot.slane %v985_v21, %v4086_v26  ;;  %v1068_v56 = vrot.slane %v987_v49, %v4086_v26  ;;  %774 = vst.msk [vmem:[#allocation2 + $0x38] sm:$0xf] %vm766_vm7, %v757_v47  ;;  %v1117_v46 = vadd.f32 %v1040_v60, %v3302_v18  ;;  %v4090_v49 = vld [vmem:[#allocation41_spill] sm:$0xff]  ;;  %v3574_v47 = vpop.permute.xlu1 %1606 }
 0x16f   :  { %v1118_v3 = vadd.f32 %v1044_v63, %v3413_v41  ;;  %v1119_v55 = vadd.f32 %v1048_v22, %v3310_v53  ;;  %v1121_v50 = vadd.f32 %v1056_v27, %v3418_v15  ;;  %v1120_v25 = vadd.f32 %v1052_v32, %v3344_v17 }
 0x170   :  { %v1122_v44 = vadd.f32 %v1060_v45, %v3350_v2  ;;  %v1123_v19 = vadd.f32 %v1064_v0, %v3422_v57  ;;  %v1124_v13 = vadd.f32 %v1068_v56, %v3356_v16  ;;  %v1133_v61 = vpack.c.bf16 %v1117_v46, %v1117_v46  ;;  %v4088_v57 = vld [vmem:[#allocation42_spill] sm:$0xff]  ;;  %v3580_v56 = vpop.permute.xlu0 %1626 }
 0x171   :  { %v1134_v59 = vpack.c.bf16 %v1118_v3, %v1118_v3  ;;  %v1135_v62 = vpack.c.bf16 %v1119_v55, %v1119_v55  ;;  %v1137_v18 = vpack.c.bf16 %v1121_v50, %v1121_v50  ;;  %v1136_v41 = vpack.c.bf16 %v1120_v25, %v1120_v25 }
 0x172   :  { %v1138_v53 = vpack.c.bf16 %v1122_v44, %v1122_v44  ;;  %v1139_v11 = vpack.c.bf16 %v1123_v19, %v1123_v19  ;;  %v1140_v15 = vpack.c.bf16 %v1124_v13, %v1124_v13  ;;  %v3534_v37 = vadd.f32 %v3455_v1, %v4087_v28  ;;  %1149 = vst.msk [vmem:[#allocation4] sm:$0xf] %vm766_vm7, %v1133_v61 }
 0x173   :  { %v3538_v17 = vmul.f32 %v3240_v8, %v3427_v20  ;;  %1150 = vst.msk [vmem:[#allocation4 + $0x8] sm:$0xf] %vm766_vm7, %v1134_v59  ;;  %1151 = vst.msk [vmem:[#allocation4 + $0x10] sm:$0xf] %vm766_vm7, %v1135_v62  ;;  %v605_v2 = vcombine.high %v3464_v42, %v3464_v42  ;;  %v612_v16 = vrot.slane %v3464_v42, %v4079_v7  ;;  %v4089_v20 = vld [vmem:[#allocation39_spill] sm:$0xff] }
 0x174   :  { %1153 = vst.msk [vmem:[#allocation4 + $0x20] sm:$0xf] %vm766_vm7, %v1137_v18  ;;  %v3550_v1 = vadd.f32 %v3460_v4, %v4088_v57  ;;  %v3554_v9 = vmul.f32 %v2933_v35, %v4089_v20  ;;  %1152 = vst.msk [vmem:[#allocation4 + $0x18] sm:$0xf] %vm766_vm7, %v1136_v41  ;;  %v988_v6 = vcombine.high %v3466_v48, %v3466_v48 }
 0x175   :  { %1154 = vst.msk [vmem:[#allocation4 + $0x28] sm:$0xf] %vm766_vm7, %v1138_v53  ;;  %1155 = vst.msk [vmem:[#allocation4 + $0x30] sm:$0xf] %vm766_vm7, %v1139_v11  ;;  %v995_v42 = vrot.slane %v3466_v48, %v4079_v7  ;;  %v3566_v4 = vmul.f32 %v4083_v5, %v4089_v20  ;;  %v619_v43 = vrot.slane %v605_v2, %v4079_v7 }
 0x176   :  { %1156 = vst.msk [vmem:[#allocation4 + $0x38] sm:$0xf] %vm766_vm7, %v1140_v15  ;;  %v620_v21 = vcombine.high %v612_v16, %v612_v16  ;;  %v628_v10 = vrot.slane %v612_v16, %v4079_v7  ;;  %v3572_v60 = vmul.f32 %v2933_v35, %v4090_v49  ;;  %v1002_v63 = vrot.slane %v988_v6, %v4079_v7  ;;  %v3594_v15 = vpop.permute.xlu1 %1614 }
 0x177   :  { %v1003_v22 = vcombine.high %v995_v42, %v995_v42  ;;  %v1011_v48 = vrot.slane %v995_v42, %v4079_v7  ;;  %v621_v27 = vcombine.high %v619_v43, %v619_v43  ;;  %v635_v32 = vrot.slane %v619_v43, %v4079_v7  ;;  %v3603_v43 = vpop.permute.xlu0 %1634 }
 0x178   :  { %v642_v45 = vrot.slane %v620_v21, %v4079_v7  ;;  %v650_v0 = vcombine.high %v628_v10, %v628_v10  ;;  %v689_v46 = vrot.slane %v628_v10, %v4086_v26  ;;  %v1004_v3 = vcombine.high %v1002_v63, %v1002_v63 }
 0x179   :  { %v1018_v35 = vrot.slane %v1002_v63, %v4079_v7  ;;  %v1025_v55 = vrot.slane %v1003_v22, %v4079_v7  ;;  %v649_v50 = vrot.slane %v621_v27, %v4079_v7  ;;  %v651_v25 = vcombine.high %v635_v32, %v635_v32 }
 0x17a   :  { %v652_v44 = vcombine.high %v642_v45, %v642_v45  ;;  %v693_v19 = vrot.slane %v642_v45, %v4086_v26  ;;  %v697_v13 = vrot.slane %v650_v0, %v4086_v26  ;;  %v705_v61 = vrot.slane %v635_v32, %v4086_v26 }
 0x17b   :  { %v742_v59 = vadd.f32 %v689_v46, %v3425_v58  ;;  %v1032_v62 = vrot.slane %v1004_v3, %v4079_v7  ;;  %v653_v18 = vcombine.high %v649_v50, %v649_v50  ;;  %v709_v53 = vrot.slane %v649_v50, %v4086_v26  ;;  %v3617_v3 = vpop.permute.xlu1 %1622 }
 0x17c   :  { %v701_v41 = vrot.slane %v652_v44, %v4086_v26  ;;  %v713_v11 = vrot.slane %v651_v25, %v4086_v26  ;;  %v743_v28 = vadd.f32 %v693_v19, %v3359_v30  ;;  %v744_v2 = vadd.f32 %v697_v13, %v3433_v29 }
 0x17d   :  { %v746_v16 = vadd.f32 %v705_v61, %v3439_v54  ;;  %v758_v57 = vpack.c.bf16 %v742_v59, %v742_v59  ;;  %v717_v58 = vrot.slane %v653_v18, %v4086_v26  ;;  %v747_v6 = vadd.f32 %v709_v53, %v3370_v24  ;;  %v1643_v61 = vpop.permute.xlu0 %1642  ;;  %v4091_v18 = vld [vmem:[#allocation59_spill] sm:$0xff] }
 0x17e   :  { %v745_v20 = vadd.f32 %v701_v41, %v3365_v14  ;;  %v748_v42 = vadd.f32 %v713_v11, %v3447_v39  ;;  %v759_v21 = vpack.c.bf16 %v743_v28, %v743_v28  ;;  %v760_v10 = vpack.c.bf16 %v744_v2, %v744_v2  ;;  %v4093_v11 = vld [vmem:[#allocation60_spill] sm:$0xff] }
 0x17f   :  { %v762_v63 = vpack.c.bf16 %v746_v16, %v746_v16  ;;  %775 = vst.msk [vmem:[#allocation2 + $0x40] sm:$0xf] %vm766_vm7, %v758_v57  ;;  %v1033_v30 = vcombine.high %v1011_v48, %v1011_v48  ;;  %v749_v29 = vadd.f32 %v717_v58, %v3375_v52  ;;  %v763_v22 = vpack.c.bf16 %v747_v6, %v747_v6 }
 0x180   :  { %v761_v54 = vpack.c.bf16 %v745_v20, %v745_v20  ;;  %v764_v27 = vpack.c.bf16 %v748_v42, %v748_v42  ;;  %776 = vst.msk [vmem:[#allocation2 + $0x48] sm:$0xf] %vm766_vm7, %v759_v21  ;;  %777 = vst.msk [vmem:[#allocation2 + $0x50] sm:$0xf] %vm766_vm7, %v760_v10  ;;  %v1034_v14 = vcombine.high %v1018_v35, %v1018_v35  ;;  %v4095_v42 = vld [vmem:[#allocation10_spill] sm:$0xff] }
 0x181   :  { %779 = vst.msk [vmem:[#allocation2 + $0x60] sm:$0xf] %vm766_vm7, %v762_v63  ;;  %v1035_v24 = vcombine.high %v1025_v55, %v1025_v55  ;;  %v1036_v39 = vcombine.high %v1032_v62, %v1032_v62  ;;  %v1072_v32 = vrot.slane %v1011_v48, %v4086_v26  ;;  %v765_v45 = vpack.c.bf16 %v749_v29, %v749_v29 }
 0x182   :  { %778 = vst.msk [vmem:[#allocation2 + $0x58] sm:$0xf] %vm766_vm7, %v761_v54  ;;  %780 = vst.msk [vmem:[#allocation2 + $0x68] sm:$0xf] %vm766_vm7, %v763_v22  ;;  %v1076_v52 = vrot.slane %v1025_v55, %v4086_v26  ;;  %v1080_v0 = vrot.slane %v1033_v30, %v4086_v26  ;;  %v1088_v46 = vrot.slane %v1018_v35, %v4086_v26  ;;  %v4097_v30 = vld [vmem:[#allocation43_spill] sm:$0xff]  ;;  %v3660_v22 = vpop.permute.xlu1 %1630 }
 0x183   :  { %781 = vst.msk [vmem:[#allocation2 + $0x70] sm:$0xf] %vm766_vm7, %v764_v27  ;;  %v1084_v50 = vrot.slane %v1035_v24, %v4086_v26  ;;  %v1092_v25 = vrot.slane %v1032_v62, %v4086_v26  ;;  %v1096_v48 = vrot.slane %v1034_v14, %v4086_v26  ;;  %v1100_v44 = vrot.slane %v1036_v39, %v4086_v26  ;;  %v4092_v62 = vld [vmem:[#allocation13_spill] sm:$0xff]  ;;  %v2471_v24 = vld [vmem:[%s3990_s2 + $0x20] sm:$0xff] }
 0x184   :  { %782 = vst.msk [vmem:[#allocation2 + $0x78] sm:$0xf] %vm766_vm7, %v765_v45  ;;  %v1125_v19 = vadd.f32 %v1072_v32, %v3430_v34  ;;  %v1126_v55 = vadd.f32 %v1076_v52, %v3362_v23  ;;  %v1127_v13 = vadd.f32 %v1080_v0, %v3436_v31  ;;  %v1129_v35 = vadd.f32 %v1088_v46, %v3444_v40  ;;  %v4094_v31 = vld [vmem:[#allocation15_spill] sm:$0xff]  ;;  %v4102_v45 = vld [vmem:[#allocation58_spill] sm:$0xff]  ;;  %v4103_v46 = vld [vmem:[#allocation61_spill] sm:$0xff] }
 0x185   :  { %v1128_v59 = vadd.f32 %v1084_v50, %v3368_v38  ;;  %v1130_v41 = vadd.f32 %v1092_v25, %v4091_v18  ;;  %v1131_v53 = vadd.f32 %v1096_v48, %v4092_v62  ;;  %v1132_v28 = vadd.f32 %v1100_v44, %v4093_v11  ;;  %v4096_v38 = vld [vmem:[#allocation14_spill] sm:$0xff]  ;;  %v1651_v25 = vpop.permute.xlu0 %1650 }
 0x186   :  { %v1141_v2 = vpack.c.bf16 %v1125_v19, %v1125_v19  ;;  %v1142_v16 = vpack.c.bf16 %v1126_v55, %v1126_v55  ;;  %v1143_v57 = vpack.c.bf16 %v1127_v13, %v1127_v13  ;;  %v1145_v58 = vpack.c.bf16 %v1129_v35, %v1129_v35  ;;  %v4105_v19 = vld [vmem:[#allocation12_spill] sm:$0xff] }
 0x187   :  { %v1144_v34 = vpack.c.bf16 %v1128_v59, %v1128_v59  ;;  %v1146_v20 = vpack.c.bf16 %v1130_v41, %v1130_v41  ;;  %v1147_v23 = vpack.c.bf16 %v1131_v53, %v1131_v53  ;;  %v1148_v6 = vpack.c.bf16 %v1132_v28, %v1132_v28  ;;  %v4106_v59 = vld [vmem:[#allocation45_spill] sm:$0xff]  ;;  %v4107_v53 = vld [vmem:[#allocation46_spill] sm:$0xff] }
 0x188   :  { %v3634_v40 = vmul.f32 %v4095_v42, %v4094_v31  ;;  %v3638_v21 = vadd.f32 %v4096_v38, %v3534_v37  ;;  %v3642_v10 = vadd.f32 %v3538_v17, %v3550_v1  ;;  %v2009_v63 = vmul.f32 %v4083_v5, %v4090_v49  ;;  %1157 = vst.msk [vmem:[#allocation4 + $0x40] sm:$0xf] %vm766_vm7, %v1141_v2  ;;  %v4098_v37 = vld [vmem:[#allocation47_spill] sm:$0xff]  ;;  %v4099_v1 = vld [vmem:[#allocation54_spill] sm:$0xff]  ;;  %v1639_v38 = vpop.permute.xlu1 %1638 }
 0x189   :  { %1158 = vst.msk [vmem:[#allocation4 + $0x48] sm:$0xf] %vm766_vm7, %v1142_v16  ;;  %1159 = vst.msk [vmem:[#allocation4 + $0x50] sm:$0xf] %vm766_vm7, %v1143_v57  ;;  %v1583_v29 = vadd.f32 %v3572_v60, %v4097_v30  ;;  %v1664_v54 = vmul.f32 %v4098_v37, %v3502_v12  ;;  %v2042_v17 = vmul.f32 %v3240_v8, %v3502_v12  ;;  %v2470_v5 = vld [vmem:[%s3990_s2 + $0x8] sm:$0xff]  ;;  %v4100_v60 = vld [vmem:[#allocation62_spill] sm:$0xff] }
 0x18a   :  { %1161 = vst.msk [vmem:[#allocation4 + $0x60] sm:$0xf] %vm766_vm7, %v1145_v58  ;;  %v1569_v49 = vmul.f32 %v2470_v5, %v4099_v1  ;;  %1160 = vst.msk [vmem:[#allocation4 + $0x58] sm:$0xf] %vm766_vm7, %v1144_v34  ;;  %v3668_v27 = vadd.f32 %v3554_v9, %v4100_v60  ;;  %v4101_v12 = vld [vmem:[#allocation63_spill] sm:$0xff]  ;;  %v2011_v39 = vmul.f32 %v2471_v24, %v4099_v1  ;;  %v4108_v2 = vld [vmem:[#allocation22_spill] sm:$0xff] }
 0x18b   :  { %1162 = vst.msk [vmem:[#allocation4 + $0x68] sm:$0xf] %vm766_vm7, %v1146_v20  ;;  %1163 = vst.msk [vmem:[#allocation4 + $0x70] sm:$0xf] %vm766_vm7, %v1147_v23  ;;  %v3672_v14 = vadd.f32 %v3566_v4, %v4101_v12  ;;  %v1666_v32 = vmul.f32 %v4098_v37, %v3530_v33  ;;  %v1571_v52 = vmul.f32 %v2470_v5, %v4102_v45  ;;  %v4104_v4 = vld [vmem:[#allocation44_spill] sm:$0xff]  ;;  %v4110_v34 = vld [vmem:[#allocation49_spill] sm:$0xff] }
 0x18c   :  { %1164 = vst.msk [vmem:[#allocation4 + $0x78] sm:$0xf] %vm766_vm7, %v1148_v6  ;;  %v2013_v0 = vmul.f32 %v2471_v24, %v4102_v45  ;;  %v1573_v9 = vmul.f32 %v2470_v5, %v4103_v46  ;;  %v2015_v50 = vmul.f32 %v2471_v24, %v4103_v46  ;;  %v2025_v48 = vadd.f32 %v2009_v63, %v4104_v4  ;;  %v4109_v57 = vld [vmem:[#allocation48_spill] sm:$0xff]  ;;  %v4111_v23 = vld [vmem:[#allocation50_spill] sm:$0xff]  ;;  %v4112_v31 = vld [vmem:[#allocation51_spill] sm:$0xff]  ;;  %s2526_s2 = smov [#allocation2]  }
 0x18d   :  { %v2044_v44 = vmul.f32 %v3240_v8, %v3530_v33  ;;  %v1575_v55 = vmul.f32 %v2470_v5, %v4105_v19  ;;  %v2017_v13 = vmul.f32 %v2471_v24, %v4105_v19  ;;  %v3689_v35 = vadd.f32 %v1664_v54, %v1583_v29  ;;  %v4114_v30 = vld [vmem:[#allocation53_spill] sm:$0xff]  ;;  %s2304_s1 = sshll.u32 %s2526_s2, 4  ;;  %s3929_s1 = int_to_ptr.vmem [resolvable:$true] %s2304_s1 }
 0x18e   :  { %v1585_v18 = vadd.f32 %v1569_v49, %v4106_v59  ;;  %v1668_v41 = vmul.f32 %v4098_v37, %v3580_v56  ;;  %v2046_v62 = vmul.f32 %v3240_v8, %v3580_v56  ;;  %v2027_v11 = vadd.f32 %v2011_v39, %v4107_v53  ;;  %v4113_v56 = vld [vmem:[#allocation52_spill] sm:$0xff]  ;;  %v1659_v39 = vpop.permute.xlu0 %1658  ;;  %v4117_v19 = vld [vmem:[#allocation57_spill] sm:$0xff]  ;;  %s2472_s20 = scalar_lea.vmem %s3929_s1, 2048  ;;  %p2477_p1 = scmp.lt.s32.totalorder %s3929_s1, %s3929_s1 }
 0x18f   :  { %v1670_v28 = vmul.f32 %v4098_v37, %v3603_v43  ;;  %v2048_v33 = vmul.f32 %v3240_v8, %v3603_v43  ;;  %v1577_v16 = vmul.f32 %v2470_v5, %v4108_v2  ;;  %v1587_v58 = vadd.f32 %v1571_v52, %v4109_v57  ;;  %p2473_p0 = scmp.ne.s32.totalorder %s3929_s1, %s2472_s20  ;;  %p2478_p2 = scmp.lt.s32.totalorder %s2472_s20, %s2472_s20 }
 0x190   :  { %v2029_v20 = vadd.f32 %v2013_v0, %v4110_v34  ;;  %v1589_v6 = vadd.f32 %v1573_v9, %v4111_v23  ;;  %v2031_v42 = vadd.f32 %v2015_v50, %v4112_v31  ;;  %v1591_v63 = vadd.f32 %v1575_v55, %v4113_v56  ;;  %v4115_v0 = vld [vmem:[#allocation55_spill] sm:$0xff]  ;;  %v4120_v56 = vld [vmem:[#allocation26_spill] sm:$0xff] }
 0x191   :  { %v2033_v29 = vadd.f32 %v2017_v13, %v4114_v30  ;;  %v1672_v54 = vmul.f32 %v4098_v37, %v1643_v61  ;;  %v2050_v1 = vmul.f32 %v3240_v8, %v1643_v61  ;;  %v3710_v43 = vadd.f32 %v2042_v17, %v2025_v48  ;;  %v4116_v48 = vld [vmem:[#allocation56_spill] sm:$0xff]  ;;  %v4121_v30 = vld [vmem:[#allocation27_spill] sm:$0xff]  ;;  %p2479_p3 = por %p2478_p2, %p2477_p1 }
 0x192   :  { %v2019_v49 = vmul.f32 %v2471_v24, %v4108_v2  ;;  %v1579_v60 = vmul.f32 %v2470_v5, %v3496_v36  ;;  %v2021_v12 = vmul.f32 %v2471_v24, %v3496_v36  ;;  %v3715_v45 = vadd.f32 %v1666_v32, %v1585_v18  ;;  %v1647_v18 = vpop.permute.xlu1 %1646 }
 0x193   :  { %v3717_v52 = vadd.f32 %v2044_v44, %v2027_v11  ;;  %v1593_v46 = vadd.f32 %v1577_v16, %v4115_v0  ;;  %v1674_v9 = vmul.f32 %v4098_v37, %v1651_v25  ;;  %v3721_v50 = vadd.f32 %v1668_v41, %v1587_v58  ;;  %p2480_p4 = pnand %p2479_p3, %p2473_p0 }
 0x194   :  { %v3723_v61 = vadd.f32 %v2046_v62, %v2029_v20  ;;  %v3725_v17 = vadd.f32 %v1670_v28, %v1589_v6  ;;  %v3727_v4 = vadd.f32 %v2048_v33, %v2031_v42  ;;  %v3729_v5 = vadd.f32 %v1672_v54, %v1591_v63  ;;  %v4118_v20 = vld [vmem:[#allocation24_spill] sm:$0xff]  ;;  %v4119_v6 = vld [vmem:[#allocation25_spill] sm:$0xff] }
 0x195   :  { %v3731_v36 = vadd.f32 %v2050_v1, %v2033_v29  ;;  %v2052_v24 = vmul.f32 %v3240_v8, %v1651_v25  ;;  %v1676_v32 = vmul.f32 %v4098_v37, %v1659_v39  ;;  %v2035_v44 = vadd.f32 %v2019_v49, %v4116_v48  ;;  %v4122_v54 = vld [vmem:[#allocation28_spill] sm:$0xff]  ;;  %v4123_v49 = vld [vmem:[#allocation29_spill] sm:$0xff] }
 0x196   :  { %v1595_v55 = vadd.f32 %v1579_v60, %v4117_v19  ;;  %v2037_v13 = vadd.f32 %v2021_v12, %v3634_v40  ;;  %v2054_v59 = vmul.f32 %v3240_v8, %v1659_v39  ;;  %v3739_v41 = vadd.f32 %v1674_v9, %v1593_v46  ;;  %v4124_v12 = vld [vmem:[#allocation30_spill] sm:$0xff] }
 0x197   :  { %v1662_v62 = vmul.f32 %v4098_v37, %v3524_v51  ;;  %v2040_v53 = vmul.f32 %v3240_v8, %v3524_v51  ;;  %v1663_v25 = vmul.f32 %v4098_v37, %v3574_v47  ;;  %v2041_v11 = vmul.f32 %v3240_v8, %v3574_v47 }
 0x198   :  { %v1665_v40 = vmul.f32 %v4098_v37, %v3594_v15  ;;  %v2043_v28 = vmul.f32 %v3240_v8, %v3594_v15  ;;  %v1667_v33 = vmul.f32 %v4098_v37, %v3617_v3  ;;  %v2045_v2 = vmul.f32 %v3240_v8, %v3617_v3 }
 0x199   :  { %v1669_v51 = vmul.f32 %v4098_v37, %v3660_v22  ;;  %v2047_v16 = vmul.f32 %v3240_v8, %v3660_v22  ;;  %v1671_v47 = vmul.f32 %v4098_v37, %v1639_v38  ;;  %v3762_v57 = vadd.f32 %v2052_v24, %v2035_v44  ;;  %v4127_v24 = vld [vmem:[#allocation33_spill] sm:$0xff] }
 0x19a   :  { %v3764_v58 = vadd.f32 %v1676_v32, %v1595_v55  ;;  %v3766_v34 = vadd.f32 %v2054_v59, %v2037_v13  ;;  %v2049_v15 = vmul.f32 %v3240_v8, %v1639_v38  ;;  %v1678_v23 = vadd.f32 %v1662_v62, %v4118_v20  ;;  %v3783_v38 = vpop.permute.xlu1 %1654  ;;  %v1247_v9 = vpop.f32.mrb[4].mxu0  ;;  %v4128_v59 = vld [vmem:[#allocation34_spill] sm:$0xff] }
 0x19b   :  { %v3771_v3 = vadd.f32 %v2040_v53, %v4119_v6  ;;  %v1679_v31 = vadd.f32 %v1663_v25, %v3668_v27  ;;  %v1673_v42 = vmul.f32 %v4098_v37, %v1647_v18  ;;  %v3776_v22 = vadd.f32 %v2041_v11, %v3672_v14  ;;  %v4125_v27 = vld [vmem:[#allocation31_spill] sm:$0xff]  ;;  %v4126_v14 = vld [vmem:[#allocation32_spill] sm:$0xff]  ;;  %v1981_v55 = vpop.f32.mrb[4].mxu1  ;;  %v2421_v13 = vpop.f32.mrb[5].mxu0 }
 0x19c   :  { %v1681_v63 = vadd.f32 %v1665_v40, %v4120_v56  ;;  %v3780_v29 = vadd.f32 %v2043_v28, %v4121_v30  ;;  %v1683_v1 = vadd.f32 %v1667_v33, %v4122_v54  ;;  %v3786_v60 = vadd.f32 %v2045_v2, %v4123_v49  ;;  %v2431_v40 = vpop.f32.mrb[5].mxu1  ;;  %v3812_v28 = vpop.f32.mrb[6].mxu0 }
 0x19d   :  { %v3789_v39 = vadd.f32 %v1669_v51, %v4124_v12  ;;  %v3792_v0 = vadd.f32 %v2047_v16, %v4125_v27  ;;  %v3795_v46 = vadd.f32 %v1671_v47, %v4126_v14  ;;  %v3798_v32 = vadd.f32 %v2049_v15, %v4127_v24  ;;  %v3818_v16 = vpop.f32.mrb[6].mxu1  ;;  %v2422_v47 = vpop.f32.mrb[7].mxu0 }
 0x19e   :  { %v3801_v48 = vmul.f32 %v3240_v8, %v1647_v18  ;;  %v1695_v44 = vcombine.high %v1247_v9, %v1247_v9  ;;  %v1702_v19 = vrot.slane %v1247_v9, %v4079_v7  ;;  %v3805_v62 = vadd.f32 %v1673_v42, %v4128_v59  ;;  %v2432_v42 = vpop.f32.mrb[7].mxu1 }
 0x19f   :  { %v3809_v53 = vmul.f32 %v4098_v37, %v3783_v38  ;;  %v2073_v25 = vcombine.high %v1981_v55, %v1981_v55  ;;  %v2080_v11 = vrot.slane %v1981_v55, %v4079_v7  ;;  %v1744_v51 = vcombine.high %v3812_v28, %v3812_v28 }
 0x1a0   :  { %v1709_v18 = vrot.slane %v1695_v44, %v4079_v7  ;;  %v1710_v33 = vcombine.high %v1702_v19, %v1702_v19  ;;  %v1718_v2 = vrot.slane %v1702_v19, %v4079_v7  ;;  %v3824_v6 = vrot.slane %v3812_v28, %v4079_v7 }
 0x1a1   :  { %v2087_v37 = vrot.slane %v2073_v25, %v4079_v7  ;;  %v2088_v15 = vcombine.high %v2080_v11, %v2080_v11  ;;  %v2096_v20 = vrot.slane %v2080_v11, %v4079_v7  ;;  %v2053_v28 = vmul.f32 %v3240_v8, %v3783_v38 }
 0x1a2   :  { %v1711_v56 = vcombine.high %v1709_v18, %v1709_v18  ;;  %v1725_v30 = vrot.slane %v1709_v18, %v4079_v7  ;;  %v1732_v54 = vrot.slane %v1710_v33, %v4079_v7  ;;  %v1740_v49 = vcombine.high %v1718_v2, %v1718_v2 }
 0x1a3   :  { %v1796_v12 = vrot.slane %v1718_v2, %v4086_v26  ;;  %v2089_v27 = vcombine.high %v2087_v37, %v2087_v37  ;;  %v2103_v14 = vrot.slane %v2087_v37, %v4079_v7  ;;  %v2110_v9 = vrot.slane %v2088_v15, %v4079_v7 }
 0x1a4   :  { %v1739_v24 = vrot.slane %v1711_v56, %v4079_v7  ;;  %v1741_v44 = vcombine.high %v1725_v30, %v1725_v30  ;;  %v1742_v19 = vcombine.high %v1732_v54, %v1732_v54  ;;  %v1800_v55 = vrot.slane %v1732_v54, %v4086_v26 }
 0x1a5   :  { %v1804_v13 = vrot.slane %v1740_v49, %v4086_v26  ;;  %v1812_v59 = vrot.slane %v1725_v30, %v4086_v26  ;;  %v1873_v25 = vadd.f32 %v1796_v12, %v3638_v21  ;;  %v2117_v11 = vrot.slane %v2089_v27, %v4079_v7 }
 0x1a6   :  { %v1743_v40 = vcombine.high %v1739_v24, %v1739_v24  ;;  %v1808_v18 = vrot.slane %v1742_v19, %v4086_v26  ;;  %v1816_v33 = vrot.slane %v1739_v24, %v4086_v26  ;;  %v1820_v2 = vrot.slane %v1741_v44, %v4086_v26 }
 0x1a7   :  { %v1874_v47 = vadd.f32 %v1800_v55, %v1678_v23  ;;  %v1875_v37 = vadd.f32 %v1804_v13, %v1679_v31  ;;  %v1877_v15 = vadd.f32 %v1812_v59, %v1681_v63  ;;  %v1889_v42 = vpack.c.bf16 %v1873_v25, %v1873_v25 }
 0x1a8   :  { %v1824_v56 = vrot.slane %v1743_v40, %v4086_v26  ;;  %v1876_v54 = vadd.f32 %v1808_v18, %v3689_v35  ;;  %v1878_v30 = vadd.f32 %v1816_v33, %v3715_v45  ;;  %v1879_v21 = vadd.f32 %v1820_v2, %v1683_v1 }
 0x1a9   :  { %v1890_v49 = vpack.c.bf16 %v1874_v47, %v1874_v47  ;;  %v1891_v12 = vpack.c.bf16 %v1875_v37, %v1875_v37  ;;  %v1893_v27 = vpack.c.bf16 %v1877_v15, %v1877_v15  ;;  %1905 = vst.msk [vmem:[#allocation2 + $0x4] sm:$0xf] %vm766_vm7, %v1889_v42  ;;  %v2118_v19 = vcombine.high %v2096_v20, %v2096_v20 }
 0x1aa   :  { %v1880_v24 = vadd.f32 %v1824_v56, %v3721_v50  ;;  %v1892_v44 = vpack.c.bf16 %v1876_v54, %v1876_v54  ;;  %v1894_v23 = vpack.c.bf16 %v1878_v30, %v1878_v30  ;;  %v1895_v31 = vpack.c.bf16 %v1879_v21, %v1879_v21 }
 0x1ab   :  { %1906 = vst.msk [vmem:[#allocation2 + $0xc] sm:$0xf] %vm766_vm7, %v1890_v49  ;;  %1907 = vst.msk [vmem:[#allocation2 + $0x14] sm:$0xf] %vm766_vm7, %v1891_v12  ;;  %v2119_v35 = vcombine.high %v2103_v14, %v2103_v14  ;;  %v2120_v45 = vcombine.high %v2110_v9, %v2110_v9  ;;  %v2121_v63 = vcombine.high %v2117_v11, %v2117_v11  ;;  %v4130_v12 = vld [vmem:[#allocation36_spill] sm:$0xff] }
 0x1ac   :  { %1909 = vst.msk [vmem:[#allocation2 + $0x24] sm:$0xf] %vm766_vm7, %v1893_v27  ;;  %v2174_v1 = vrot.slane %v2096_v20, %v4086_v26  ;;  %v1896_v55 = vpack.c.bf16 %v1880_v24, %v1880_v24  ;;  %1908 = vst.msk [vmem:[#allocation2 + $0x1c] sm:$0xf] %vm766_vm7, %v1892_v44  ;;  %v2178_v50 = vrot.slane %v2110_v9, %v4086_v26 }
 0x1ad   :  { %1910 = vst.msk [vmem:[#allocation2 + $0x2c] sm:$0xf] %vm766_vm7, %v1894_v23  ;;  %1911 = vst.msk [vmem:[#allocation2 + $0x34] sm:$0xf] %vm766_vm7, %v1895_v31  ;;  %v2182_v13 = vrot.slane %v2118_v19, %v4086_v26  ;;  %v2190_v59 = vrot.slane %v2103_v14, %v4086_v26  ;;  %v2186_v25 = vrot.slane %v2120_v45, %v4086_v26 }
 0x1ae   :  { %v2194_v40 = vrot.slane %v2117_v11, %v4086_v26  ;;  %v2198_v18 = vrot.slane %v2119_v35, %v4086_v26  ;;  %v2202_v20 = vrot.slane %v2121_v63, %v4086_v26  ;;  %1912 = vst.msk [vmem:[#allocation2 + $0x3c] sm:$0xf] %vm766_vm7, %v1896_v55  ;;  %v2251_v33 = vadd.f32 %v2174_v1, %v3642_v10 }
 0x1af   :  { %v2252_v2 = vadd.f32 %v2178_v50, %v3771_v3  ;;  %v2253_v9 = vadd.f32 %v2182_v13, %v3776_v22  ;;  %v2255_v47 = vadd.f32 %v2190_v59, %v3780_v29  ;;  %v2254_v14 = vadd.f32 %v2186_v25, %v3710_v43  ;;  %v4129_v29 = vld [vmem:[#allocation35_spill] sm:$0xff] }
 0x1b0   :  { %v2256_v37 = vadd.f32 %v2194_v40, %v3717_v52  ;;  %v2257_v11 = vadd.f32 %v2198_v18, %v3786_v60  ;;  %v2258_v15 = vadd.f32 %v2202_v20, %v3723_v61  ;;  %v2267_v42 = vpack.c.bf16 %v2251_v33, %v2251_v33 }
 0x1b1   :  { %v2268_v56 = vpack.c.bf16 %v2252_v2, %v2252_v2  ;;  %v2269_v54 = vpack.c.bf16 %v2253_v9, %v2253_v9  ;;  %v2271_v30 = vpack.c.bf16 %v2255_v47, %v2255_v47  ;;  %v2270_v21 = vpack.c.bf16 %v2254_v14, %v2254_v14 }
 0x1b2   :  { %v2272_v10 = vpack.c.bf16 %v2256_v37, %v2256_v37  ;;  %v2273_v49 = vpack.c.bf16 %v2257_v11, %v2257_v11  ;;  %v2274_v3 = vpack.c.bf16 %v2258_v15, %v2258_v15  ;;  %2283 = vst.msk [vmem:[#allocation4 + $0x4] sm:$0xf] %vm766_vm7, %v2267_v42  ;;  %v1758_v43 = vrot.slane %v1744_v51, %v4079_v7 }
 0x1b3   :  { %2284 = vst.msk [vmem:[#allocation4 + $0xc] sm:$0xf] %vm766_vm7, %v2268_v56  ;;  %2285 = vst.msk [vmem:[#allocation4 + $0x14] sm:$0xf] %vm766_vm7, %v2269_v54  ;;  %v1759_v52 = vcombine.high %v3824_v6, %v3824_v6  ;;  %v1767_v61 = vrot.slane %v3824_v6, %v4079_v7  ;;  %v2122_v22 = vcombine.high %v3818_v16, %v3818_v16 }
 0x1b4   :  { %2287 = vst.msk [vmem:[#allocation4 + $0x24] sm:$0xf] %vm766_vm7, %v2271_v30  ;;  %v3884_v60 = vadd.f32 %v3801_v48, %v4129_v29  ;;  %v1691_v27 = vadd.f32 %v3809_v53, %v4130_v12  ;;  %2286 = vst.msk [vmem:[#allocation4 + $0x1c] sm:$0xf] %vm766_vm7, %v2270_v21  ;;  %v2129_v51 = vrot.slane %v3818_v16, %v4079_v7  ;;  %v4131_v30 = vld [vmem:[#allocation37_spill] sm:$0xff] }
 0x1b5   :  { %2288 = vst.msk [vmem:[#allocation4 + $0x2c] sm:$0xf] %vm766_vm7, %v2272_v10  ;;  %2289 = vst.msk [vmem:[#allocation4 + $0x34] sm:$0xf] %vm766_vm7, %v2273_v49  ;;  %v1760_v6 = vcombine.high %v1758_v43, %v1758_v43  ;;  %v1774_v48 = vrot.slane %v1758_v43, %v4079_v7  ;;  %v1781_v19 = vrot.slane %v1759_v52, %v4079_v7 }
 0x1b6   :  { %2290 = vst.msk [vmem:[#allocation4 + $0x3c] sm:$0xf] %vm766_vm7, %v2274_v3  ;;  %v1789_v53 = vcombine.high %v1767_v61, %v1767_v61  ;;  %v1828_v24 = vrot.slane %v1767_v61, %v4086_v26  ;;  %v2136_v8 = vrot.slane %v2122_v22, %v4079_v7  ;;  %v2137_v38 = vcombine.high %v2129_v51, %v2129_v51 }
 0x1b7   :  { %v2145_v44 = vrot.slane %v2129_v51, %v4079_v7  ;;  %v1788_v23 = vrot.slane %v1760_v6, %v4079_v7  ;;  %v1790_v31 = vcombine.high %v1774_v48, %v1774_v48  ;;  %v1791_v35 = vcombine.high %v1781_v19, %v1781_v19 }
 0x1b8   :  { %v1832_v45 = vrot.slane %v1781_v19, %v4086_v26  ;;  %v1836_v16 = vrot.slane %v1789_v53, %v4086_v26  ;;  %v1844_v63 = vrot.slane %v1774_v48, %v4086_v26  ;;  %v1881_v1 = vadd.f32 %v1828_v24, %v3789_v39 }
 0x1b9   :  { %v2138_v55 = vcombine.high %v2136_v8, %v2136_v8  ;;  %v1792_v50 = vcombine.high %v1788_v23, %v1788_v23  ;;  %v1840_v13 = vrot.slane %v1791_v35, %v4086_v26  ;;  %v1848_v59 = vrot.slane %v1788_v23, %v4086_v26 }
 0x1ba   :  { %v1852_v25 = vrot.slane %v1790_v31, %v4086_v26  ;;  %v1882_v40 = vadd.f32 %v1832_v45, %v3725_v17  ;;  %v1883_v18 = vadd.f32 %v1836_v16, %v3795_v46  ;;  %v1885_v20 = vadd.f32 %v1844_v63, %v3805_v62 }
 0x1bb   :  { %v1897_v33 = vpack.c.bf16 %v1881_v1, %v1881_v1  ;;  %v1856_v2 = vrot.slane %v1792_v50, %v4086_v26  ;;  %v1884_v9 = vadd.f32 %v1840_v13, %v3729_v5  ;;  %v1886_v39 = vadd.f32 %v1848_v59, %v3739_v41 }
 0x1bc   :  { %v1887_v47 = vadd.f32 %v1852_v25, %v1691_v27  ;;  %v1898_v14 = vpack.c.bf16 %v1882_v40, %v1882_v40  ;;  %v1899_v37 = vpack.c.bf16 %v1883_v18, %v1883_v18  ;;  %v1901_v11 = vpack.c.bf16 %v1885_v20, %v1885_v20 }
 0x1bd   :  { %1913 = vst.msk [vmem:[#allocation2 + $0x44] sm:$0xf] %vm766_vm7, %v1897_v33  ;;  %v2152_v15 = vrot.slane %v2136_v8, %v4079_v7  ;;  %v1888_v17 = vadd.f32 %v1856_v2, %v3764_v58  ;;  %v1900_v46 = vpack.c.bf16 %v1884_v9, %v1884_v9  ;;  %v1902_v62 = vpack.c.bf16 %v1886_v39, %v1886_v39 }
 0x1be   :  { %v1903_v42 = vpack.c.bf16 %v1887_v47, %v1887_v47  ;;  %1914 = vst.msk [vmem:[#allocation2 + $0x4c] sm:$0xf] %vm766_vm7, %v1898_v14  ;;  %1915 = vst.msk [vmem:[#allocation2 + $0x54] sm:$0xf] %vm766_vm7, %v1899_v37  ;;  %v2159_v5 = vrot.slane %v2137_v38, %v4079_v7  ;;  %v2166_v41 = vrot.slane %v2138_v55, %v4079_v7 }
 0x1bf   :  { %1917 = vst.msk [vmem:[#allocation2 + $0x64] sm:$0xf] %vm766_vm7, %v1901_v11  ;;  %v2167_v56 = vcombine.high %v2145_v44, %v2145_v44  ;;  %v2168_v54 = vcombine.high %v2152_v15, %v2152_v15  ;;  %v2069_v21 = vadd.f32 %v2053_v28, %v4131_v30  ;;  %v1904_v10 = vpack.c.bf16 %v1888_v17, %v1888_v17 }
 0x1c0   :  { %1916 = vst.msk [vmem:[#allocation2 + $0x5c] sm:$0xf] %vm766_vm7, %v1900_v46  ;;  %1918 = vst.msk [vmem:[#allocation2 + $0x6c] sm:$0xf] %vm766_vm7, %v1902_v62  ;;  %v2206_v58 = vrot.slane %v2145_v44, %v4086_v26  ;;  %v2222_v49 = vrot.slane %v2152_v15, %v4086_v26  ;;  %v2169_v7 = vcombine.high %v2159_v5, %v2159_v5 }
 0x1c1   :  { %1919 = vst.msk [vmem:[#allocation2 + $0x74] sm:$0xf] %vm766_vm7, %v1903_v42  ;;  %v2170_v3 = vcombine.high %v2166_v41, %v2166_v41  ;;  %v2210_v43 = vrot.slane %v2159_v5, %v4086_v26  ;;  %v2214_v52 = vrot.slane %v2167_v56, %v4086_v26  ;;  %1920 = vst.msk [vmem:[#allocation2 + $0x7c] sm:$0xf] %vm766_vm7, %v1904_v10 }
 0x1c2   :  { %v2226_v61 = vrot.slane %v2166_v41, %v4086_v26  ;;  %v2230_v22 = vrot.slane %v2168_v54, %v4086_v26  ;;  %v2259_v29 = vadd.f32 %v2206_v58, %v3792_v0  ;;  %v2263_v12 = vadd.f32 %v2222_v49, %v3884_v60 }
 0x1c3   :  { %v2218_v27 = vrot.slane %v2169_v7, %v4086_v26  ;;  %v2234_v28 = vrot.slane %v2170_v3, %v4086_v26  ;;  %v2260_v51 = vadd.f32 %v2210_v43, %v3727_v4  ;;  %v2261_v6 = vadd.f32 %v2214_v52, %v3798_v32 }
 0x1c4   :  { %2483 = shalt.err (!%p2480_p4)
}
 0x1c5   :  { %s2484_s23 = scalar_lea.hbm %s3992_s4, 2048 }
 0x1c6   :  { %p2485_p5 = scmp.ne.s32.totalorder %s3992_s4, %s2484_s23  ;;  %p2488_p6 = scmp.lt.u32.totalorder %s2484_s23, %s3992_s4 }
 0x1c8   :  { %p2490_p7 = pnand %p2488_p6, %p2485_p5 }
 0x1ca   :  { %2493 = shalt.err (!%p2490_p7)
}
 0x1cb   :  { %s2527_s28 = smov 64   ;;  %s2528_s29 = smov 4   ;;  %v2264_v26 = vadd.f32 %v2226_v61, %v3762_v57  ;;  %v2265_v4 = vadd.f32 %v2230_v22, %v2069_v21  ;;  %v2275_v0 = vpack.c.bf16 %v2259_v29, %v2259_v29  ;;  %v2279_v32 = vpack.c.bf16 %v2263_v12, %v2263_v12 }
 0x1cc   :  { %2310 = dma.vmem_to_hbm [thread:$0]  %s3929_s1, 2048, %s3992_s4, [#allocation3], %s2527_s28, %s2527_s28, %s2528_s29   ;;  %v2262_v60 = vadd.f32 %v2218_v27, %v3731_v36  ;;  %v2266_v48 = vadd.f32 %v2234_v28, %v3766_v34  ;;  %v2276_v19 = vpack.c.bf16 %v2260_v51, %v2260_v51  ;;  %v2277_v53 = vpack.c.bf16 %v2261_v6, %v2261_v6 }
 0x1cd   :  { %s2529_s6 = smov [#allocation4]   ;;  %v2280_v24 = vpack.c.bf16 %v2264_v26, %v2264_v26  ;;  %v2281_v8 = vpack.c.bf16 %v2265_v4, %v2265_v4  ;;  %2291 = vst.msk [vmem:[#allocation4 + $0x44] sm:$0xf] %vm766_vm7, %v2275_v0  ;;  %2295 = vst.msk [vmem:[#allocation4 + $0x64] sm:$0xf] %vm766_vm7, %v2279_v32 }
 0x1ce   :  { %s2316_s7 = sshll.u32 %s2529_s6, 4  ;;  %v2278_v38 = vpack.c.bf16 %v2262_v60, %v2262_v60  ;;  %v2282_v44 = vpack.c.bf16 %v2266_v48, %v2266_v48  ;;  %2292 = vst.msk [vmem:[#allocation4 + $0x4c] sm:$0xf] %vm766_vm7, %v2276_v19  ;;  %2293 = vst.msk [vmem:[#allocation4 + $0x54] sm:$0xf] %vm766_vm7, %v2277_v53  ;;  %s2317_s7 = int_to_ptr.vmem [resolvable:$true] %s2316_s7 }
 0x1cf   :  { %2296 = vst.msk [vmem:[#allocation4 + $0x6c] sm:$0xf] %vm766_vm7, %v2280_v24  ;;  %2297 = vst.msk [vmem:[#allocation4 + $0x74] sm:$0xf] %vm766_vm7, %v2281_v8  ;;  %s2494_s4 = scalar_lea.vmem %s2317_s7, 2048  ;;  %p2499_p9 = scmp.lt.s32.totalorder %s2317_s7, %s2317_s7 }
 0x1d0   :  { %2294 = vst.msk [vmem:[#allocation4 + $0x5c] sm:$0xf] %vm766_vm7, %v2278_v38  ;;  %2298 = vst.msk [vmem:[#allocation4 + $0x7c] sm:$0xf] %vm766_vm7, %v2282_v44  ;;  %p2495_p8 = scmp.ne.s32.totalorder %s2317_s7, %s2494_s4  ;;  %p2500_p10 = scmp.lt.s32.totalorder %s2494_s4, %s2494_s4 }
 0x1d2   :  { %p2501_p11 = por %p2500_p10, %p2499_p9 }
 0x1d4   :  { %p2502_p12 = pnand %p2501_p11, %p2495_p8 }
 0x1d6   :  { %2505 = shalt.err (!%p2502_p12)
}
 0x1d7   :  { %s2506_s10 = scalar_lea.hbm %s3993_s5, 2048 }
 0x1d8   :  { %p2507_p13 = scmp.ne.s32.totalorder %s3993_s5, %s2506_s10  ;;  %p2510_p0 = scmp.lt.u32.totalorder %s2506_s10, %s3993_s5 }
 0x1da   :  { %p2512_p1 = pnand %p2510_p0, %p2507_p13 }
 0x1dc   :  { %2515 = shalt.err (!%p2512_p1)
}
 0x1dd   :  { %2322 = dma.vmem_to_hbm [thread:$0]  %s2317_s7, 2048, %s3993_s5, [#allocation5], %s2527_s28, %s2527_s28, %s2528_s29  }
 0x1de   :  { %2516 = dma.done.wait [#allocation3], 2048  }
 0x1df   :  { %2517 = vsyncadd [#allocation3], 4294965248 }
 0x1e0   :  { %2518 = dma.done.wait [#allocation5], 2048  }
 0x1e1   :  { %2519 = vsyncadd [#allocation5], 4294965248 }
 0x1e2   :  { %2329 = vsyncpa [#allocation3], 1 }
 0x1e3   :  { %2330 = vsyncpa [#allocation5], 1 }

</bundles_post_ra>
